<compile_context>
chip_gen: v7x
topology: tpu7x:2x2x1
jax: 0.10.0
libtpu: 0.0.40
codegen_flags: <defaults>
</compile_context>

<pallas_src>
import functools

import jax
import jax.numpy as jnp
import numpy as np
from jax import lax
from jax.experimental import pallas as pl
from jax.experimental.pallas import tpu as pltpu

EPS = 1e-3        # BatchNorm2d eps=0.001
_SLAB_PAD = 8     # extra zero rows per slab so the (W+1)-offset view never reads OOB


def _conv_tile(x_ref, w_ref, *, L, W):
    """Fused sub-pixel transposed-conv matmul for one row tile.

    x_ref : (1, (R+1)*W + pad, Cin) bf16 slab (R image rows + 1 halo row, flattened).
    w_ref : (4, Cin, 4*Cout) bf16 tap blocks for the sources
            [x(i,j), x(i,j+1), x(i+1,j), x(i+1,j+1)]; columns are phases
            p = 2a+b in order [ee, eo, oe, oo].
    Returns (L, 4*Cout) f32 with L = R*W rows in (i, j) order.
    """
    s0 = x_ref[0, pl.ds(0, L), :]        # x[i, j]
    s1 = x_ref[0, pl.ds(1, L), :]        # x[i, j+1]  (wraps into next row at j=W-1)
    s2 = x_ref[0, pl.ds(W, L), :]        # x[i+1, j]  (halo row supplies the last row)
    s3 = x_ref[0, pl.ds(W + 1, L), :]    # x[i+1, j+1]

    # Zero the j = W-1 wrap column of the +1-column-shifted views.
    j = lax.broadcasted_iota(jnp.int32, (L, 1), 0) % W
    keep = j != (W - 1)
    zero = jnp.zeros((), s1.dtype)
    s1 = jnp.where(keep, s1, zero)
    s3 = jnp.where(keep, s3, zero)

    y = jnp.dot(s0, w_ref[0], preferred_element_type=jnp.float32)
    y += jnp.dot(s1, w_ref[1], preferred_element_type=jnp.float32)
    y += jnp.dot(s2, w_ref[2], preferred_element_type=jnp.float32)
    y += jnp.dot(s3, w_ref[3], preferred_element_type=jnp.float32)
    return y


def _stats_kernel(x_ref, w_ref, mean_ref, m2_ref, *, L, W):
    """Pass 1: conv matmul + per-column (phase*Cout) mean/M2, Chan-merged directly
    in the resident output blocks (constant out block index across the grid)."""
    step = pl.program_id(0)

    y = _conv_tile(x_ref, w_ref, L=L, W=W)                      # (L, 4*Cout) f32
    n_t = float(L)                                              # every tile has exactly L rows
    mean_t = jnp.sum(y, axis=0, keepdims=True) * (1.0 / n_t)    # (1, 4*Cout)
    d = y - mean_t
    m2_t = jnp.sum(d * d, axis=0, keepdims=True)                # (1, 4*Cout)

    @pl.when(step == 0)
    def _():
        mean_ref[...] = mean_t
        m2_ref[...] = m2_t

    @pl.when(step > 0)
    def _():
        n_a = step.astype(jnp.float32) * n_t
        n_new = n_a + n_t
        delta = mean_t - mean_ref[...]
        mean_ref[...] = mean_ref[...] + delta * (n_t / n_new)
        m2_ref[...] = m2_ref[...] + m2_t + delta * delta * (n_a * n_t / n_new)


def _normalize_kernel(x_ref, w_ref, scale_ref, shift_ref, out_ref, *, L, W):
    """Pass 2: recompute the conv, apply fused BN scale/shift + ReLU."""
    y = _conv_tile(x_ref, w_ref, L=L, W=W)                      # (L, 4*Cout) f32
    out_ref[...] = jnp.maximum(y * scale_ref[...] + shift_ref[...], 0.0).astype(out_ref.dtype)


def _grouped_weight(w_t, Cin, Cout):
    """(4, Cin, 4*Cout) tap blocks; row-group g = source, columns = phases [ee,eo,oe,oo]."""
    wt = w_t.astype(jnp.float32)
    tap = lambda ky, kx: wt[:, :, ky, kx]                       # (Cin, Cout)
    z = jnp.zeros((Cin, Cout), jnp.float32)
    g0 = jnp.concatenate([tap(1, 1), tap(1, 2), tap(2, 1), tap(2, 2)], axis=1)  # x[i, j]
    g1 = jnp.concatenate([z,         tap(1, 0), z,         tap(2, 0)], axis=1)  # x[i, j+1]
    g2 = jnp.concatenate([z,         z,         tap(0, 1), tap(0, 2)], axis=1)  # x[i+1, j]
    g3 = jnp.concatenate([z,         z,         z,         tap(0, 0)], axis=1)  # x[i+1, j+1]
    return jnp.stack([g0, g1, g2, g3]).astype(jnp.bfloat16)


def _pick_rows(H, W, Cin, C4, max_rows, budget_bytes):
    """Largest divisor R of H with (R*W) % 8 == 0 whose double-buffered working
    set fits the VMEM budget (input slab + f32 output tile + resident weight)."""
    best = None
    for r in range(1, H + 1):
        if H % r or r > max_rows or (r * W) % 8:
            continue
        lhp = (r + 1) * W + _SLAB_PAD
        need = (2 * lhp * Cin * 2          # double-buffered bf16 input slab
                + 2 * r * W * C4 * 4       # double-buffered f32 output tile
                + 4 * Cin * C4 * 2         # resident weight blocks
                + 8 * C4 * 4)              # scale/shift/stat rows
        if need <= budget_bytes:
            best = r
    if best is None:
        for r in range(1, H + 1):          # fall back to the smallest legal tile
            if H % r == 0 and (r * W) % 8 == 0:
                best = r
                break
    if best is None:
        raise ValueError("no row-tile size R divides H with (R*W) % 8 == 0")
    return best


@functools.partial(jax.jit,
                   static_argnames=("max_rows", "vmem_budget_bytes", "out_dtype"))
def upsampler_block(x_nchw, w_t, bias, gamma, beta, *, max_rows=256,
                    vmem_budget_bytes=8 * 1024 * 1024, out_dtype=jnp.float32):
    """x_nchw: (N, Cin, H, W); w_t: (Cin, Cout, 3, 3) PyTorch ConvTranspose2d layout.

    `bias` is accepted for interface parity but mathematically dropped: a
    per-channel constant cancels exactly under training-mode BatchNorm.
    `out_dtype=jnp.bfloat16` halves pass-2 store + final-transpose-read traffic
    if the consumer accepts bf16 (default keeps the module's f32 semantics).
    """
    del bias
    N, Cin, H, W = x_nchw.shape
    Cout = w_t.shape[1]
    C4 = 4 * Cout
    M = N * H * W

    R = _pick_rows(H, W, Cin, C4, max_rows, vmem_budget_bytes)   # input rows per tile
    T = N * (H // R)                                             # grid steps
    L = R * W                                                    # matmul rows per tile
    LHp = (R + 1) * W + _SLAB_PAD                                # slab rows (with halo + pad)

    # --- input prep: one bf16 NHWC slab per row tile, 1 halo row each --------
    x = jnp.transpose(x_nchw, (0, 2, 3, 1)).astype(jnp.bfloat16)     # (N, H, W, Cin)
    x_pad = jnp.pad(x, ((0, 0), (0, 1), (0, 0), (0, 0)))             # zero row per image
    main = x_pad[:, :H].reshape(N, H // R, R, W, Cin)
    halo = x_pad[:, R::R][:, : H // R]                               # next tile's first row / zero row
    slabs = jnp.concatenate([main, halo[:, :, None]], axis=2)        # (N, H/R, R+1, W, Cin)
    slabs = slabs.reshape(T, (R + 1) * W, Cin)
    slabs = jnp.pad(slabs, ((0, 0), (0, _SLAB_PAD), (0, 0)))         # (T, LHp, Cin) bf16

    w4 = _grouped_weight(w_t, Cin, Cout)                             # (4, Cin, 4*Cout) bf16

    stats_kernel = functools.partial(_stats_kernel, L=L, W=W)
    norm_kernel = functools.partial(_normalize_kernel, L=L, W=W)

    # --- pass 1: batch statistics (stable two-moment Chan merge) -------------
    mean_cols, m2_cols = pl.pallas_call(
        stats_kernel,
        grid=(T,),
        in_specs=[
            pl.BlockSpec((1, LHp, Cin), lambda t: (t, 0, 0)),
            pl.BlockSpec((4, Cin, C4), lambda t: (0, 0, 0)),
        ],
        out_specs=(
            pl.BlockSpec((1, C4), lambda t: (0, 0)),
            pl.BlockSpec((1, C4), lambda t: (0, 0)),
        ),
        out_shape=(
            jax.ShapeDtypeStruct((1, C4), jnp.float32),
            jax.ShapeDtypeStruct((1, C4), jnp.float32),
        ),
        compiler_params=pltpu.CompilerParams(dimension_semantics=("arbitrary",)),
    )(slabs, w4)

    # Combine the 4 phase groups into per-Cout-channel mean/var (tiny XLA math).
    m_f = jnp.float32(M)
    mean_g = mean_cols.reshape(4, Cout)
    m2_g = m2_cols.reshape(4, Cout)
    mean = jnp.mean(mean_g, axis=0)                                       # (Cout,)
    m2 = jnp.sum(m2_g, axis=0) + m_f * jnp.sum((mean_g - mean) ** 2, axis=0)
    var = m2 / (4.0 * m_f)                                                # biased var
    scale = gamma.astype(jnp.float32) * lax.rsqrt(var + EPS)
    shift = beta.astype(jnp.float32) - mean * scale
    scale4 = jnp.tile(scale, 4).reshape(1, C4)
    shift4 = jnp.tile(shift, 4).reshape(1, C4)

    # --- pass 2: recompute conv, fused BN scale/shift + ReLU -----------------
    out_flat = pl.pallas_call(
        norm_kernel,
        grid=(T,),
        in_specs=[
            pl.BlockSpec((1, LHp, Cin), lambda t: (t, 0, 0)),
            pl.BlockSpec((4, Cin, C4), lambda t: (0, 0, 0)),
            pl.BlockSpec((1, C4), lambda t: (0, 0)),
            pl.BlockSpec((1, C4), lambda t: (0, 0)),
        ],
        out_specs=pl.BlockSpec((L, C4), lambda t: (t, 0)),
        out_shape=jax.ShapeDtypeStruct((M, C4), out_dtype),
        compiler_params=pltpu.CompilerParams(dimension_semantics=("parallel",)),
    )(slabs, w4, scale4, shift4)

    # Phase interleave + channel-first in ONE fused XLA transpose:
    # out_flat[(n*H + i)*W + j, (2a+b)*Cout + c] -> out[n, c, 2i+a, 2j+b]
    out = out_flat.reshape(N, H, W, 2, 2, Cout)
    out = jnp.transpose(out, (0, 5, 1, 3, 2, 4)).reshape(N, Cout, 2 * H, 2 * W)
    return out


def reference_forward(x_nchw, w_t, bias, gamma, beta):
    """Pure-JAX f32 reference: ConvTranspose2d (with bias) -> training-mode BN -> ReLU."""
    x = jnp.transpose(x_nchw, (0, 2, 3, 1)).astype(jnp.float32)  # NHWC
    w_conv = jnp.transpose(w_t[:, :, ::-1, ::-1], (2, 3, 0, 1)).astype(jnp.float32)  # HWIO
    y = jax.lax.conv_general_dilated(
        x, w_conv, window_strides=(1, 1), padding=[(1, 2), (1, 2)],
        lhs_dilation=(2, 2), dimension_numbers=('NHWC', 'HWIO', 'NHWC'))
    y = y + bias.astype(jnp.float32)
    mean = y.mean(axis=(0, 1, 2))
    var = y.var(axis=(0, 1, 2))  # biased, as BN uses for normalization
    y = (y - mean) * (gamma.astype(jnp.float32) / jnp.sqrt(var + EPS)) + beta.astype(jnp.float32)
    return jnp.transpose(jnp.maximum(y, 0.0), (0, 3, 1, 2))  # NCHW


if __name__ == "__main__":
    N, Cin, Cout, H, W = 2, 8, 16, 16, 16

    key = jax.random.PRNGKey(0)
    kx, kw, kb, kg, kbeta = jax.random.split(key, 5)
    x = jax.random.normal(kx, (N, Cin, H, W), dtype=jnp.float32)
    w_t = jax.random.normal(kw, (Cin, Cout, 3, 3), dtype=jnp.float32) * 0.1
    bias = jax.random.normal(kb, (Cout,), dtype=jnp.float32) * 0.1
    gamma = 1.0 + 0.1 * jax.random.normal(kg, (Cout,), dtype=jnp.float32)
    beta = 0.1 * jax.random.normal(kbeta, (Cout,), dtype=jnp.float32)

    # max_rows=4 -> R=4 input rows per tile -> 8 grid steps per pass, so the
    # tiled Chan-merge accumulation and the parallel normalize pass are both
    # exercised even at this small demo size.
    out = upsampler_block(x, w_t, bias, gamma, beta, max_rows=4)
    out = jax.block_until_ready(out)
    assert out.shape == (N, Cout, 2 * H, 2 * W), out.shape

    ref = jax.block_until_ready(reference_forward(x, w_t, bias, gamma, beta))
    np.testing.assert_allclose(np.asarray(out), np.asarray(ref), rtol=5e-2, atol=5e-2)

    print("KERNEL_OK")
</pallas_src>

<mosaic_0001>
module attributes {stable_mosaic.version = 11 : i64} {
  func.func @_stats_kernel(%arg0: i32, %arg1: memref<1x88x8xbf16, #tpu.memory_space<vmem>>, %arg2: memref<4x8x64xbf16, #tpu.memory_space<vmem>>, %arg3: memref<1x64xf32, #tpu.memory_space<vmem>>, %arg4: memref<1x64xf32, #tpu.memory_space<vmem>>) attributes {dimension_semantics = [#tpu.dimension_semantics<arbitrary>], iteration_bounds = array<i64: 8>, scalar_prefetch = 0 : i64, scratch_operands = 0 : i64, tpu.core_type = #tpu.core_type<tc>, window_params = [{transform_indices = @transform_0, window_bounds = array<i64: 1, 88, 8>}, {pipeline_mode = #tpu.pipeline_mode<synchronous>, transform_indices = @transform_1, window_bounds = array<i64: 4, 8, 64>}, {pipeline_mode = #tpu.pipeline_mode<synchronous>, transform_indices = @transform_2, window_bounds = array<i64: 1, 64>}, {pipeline_mode = #tpu.pipeline_mode<synchronous>, transform_indices = @transform_3, window_bounds = array<i64: 1, 64>}]} {
    %c0 = arith.constant 0 : index
    %c0_0 = arith.constant 0 : index
    %c0_1 = arith.constant 0 : index
    %0 = vector.load %arg1[%c0, %c0_0, %c0_1] : memref<1x88x8xbf16, #tpu.memory_space<vmem>>, vector<1x64x8xbf16>
    %1 = vector.shape_cast %0 : vector<1x64x8xbf16> to vector<64x8xbf16>
    %c0_2 = arith.constant 0 : index
    %c1 = arith.constant 1 : index
    %c0_3 = arith.constant 0 : index
    %2 = vector.load %arg1[%c0_2, %c1, %c0_3] : memref<1x88x8xbf16, #tpu.memory_space<vmem>>, vector<1x64x8xbf16>
    %3 = vector.shape_cast %2 : vector<1x64x8xbf16> to vector<64x8xbf16>
    %c0_4 = arith.constant 0 : index
    %c16 = arith.constant 16 : index
    %c0_5 = arith.constant 0 : index
    %4 = vector.load %arg1[%c0_4, %c16, %c0_5] : memref<1x88x8xbf16, #tpu.memory_space<vmem>>, vector<1x64x8xbf16>
    %5 = vector.shape_cast %4 : vector<1x64x8xbf16> to vector<64x8xbf16>
    %c0_6 = arith.constant 0 : index
    %c17 = arith.constant 17 : index
    %c0_7 = arith.constant 0 : index
    %6 = vector.load %arg1[%c0_6, %c17, %c0_7] : memref<1x88x8xbf16, #tpu.memory_space<vmem>>, vector<1x64x8xbf16>
    %7 = vector.shape_cast %6 : vector<1x64x8xbf16> to vector<64x8xbf16>
    %8 = tpu.iota {dimensions = array<i32: 0>} : vector<64x1xi32>
    %c16_i32 = arith.constant 16 : i32
    %c0_i32 = arith.constant 0 : i32
    %9 = arith.cmpi eq, %c16_i32, %c0_i32 : i32
    %c1_i32 = arith.constant 1 : i32
    %10 = arith.select %9, %c1_i32, %c16_i32 : i32
    %11 = vector.broadcast %10 : i32 to vector<64x1xi32>
    %12 = arith.remsi %8, %11 : vector<64x1xi32>
    %c0_i32_8 = arith.constant 0 : i32
    %13 = vector.broadcast %c0_i32_8 : i32 to vector<64x1xi32>
    %14 = arith.cmpi ne, %12, %13 : vector<64x1xi32>
    %c0_i32_9 = arith.constant 0 : i32
    %15 = vector.broadcast %c0_i32_9 : i32 to vector<64x1xi32>
    %16 = arith.cmpi slt, %12, %15 : vector<64x1xi32>
    %c0_i32_10 = arith.constant 0 : i32
    %17 = arith.cmpi slt, %10, %c0_i32_10 : i32
    %18 = vector.broadcast %17 : i1 to vector<64x1xi1>
    %19 = vector.broadcast %18 : vector<64x1xi1> to vector<64x1xi1>
    %20 = arith.xori %16, %19 : vector<64x1xi1>
    %21 = arith.andi %20, %14 : vector<64x1xi1>
    %22 = vector.broadcast %10 : i32 to vector<64x1xi32>
    %23 = arith.addi %12, %22 : vector<64x1xi32>
    %24 = arith.select %21, %23, %12 : vector<64x1xi1>, vector<64x1xi32>
    %c15_i32 = arith.constant 15 : i32
    %25 = vector.broadcast %c15_i32 : i32 to vector<64x1xi32>
    %26 = arith.cmpi ne, %24, %25 : vector<64x1xi32>
    %cst = arith.constant 0.000000e+00 : bf16
    %27 = vector.shape_cast %26 : vector<64x1xi1> to vector<64x1xi1>
    %28 = vector.broadcast %27 : vector<64x1xi1> to vector<64x8xi1>
    %29 = vector.broadcast %cst : bf16 to vector<64x8xbf16>
    %30 = arith.select %28, %3, %29 : vector<64x8xi1>, vector<64x8xbf16>
    %cst_11 = arith.constant 0.000000e+00 : bf16
    %31 = vector.shape_cast %26 : vector<64x1xi1> to vector<64x1xi1>
    %32 = vector.broadcast %31 : vector<64x1xi1> to vector<64x8xi1>
    %33 = vector.broadcast %cst_11 : bf16 to vector<64x8xbf16>
    %34 = arith.select %32, %7, %33 : vector<64x8xi1>, vector<64x8xbf16>
    %c0_12 = arith.constant 0 : index
    %c0_13 = arith.constant 0 : index
    %c0_14 = arith.constant 0 : index
    %35 = vector.load %arg2[%c0_12, %c0_13, %c0_14] : memref<4x8x64xbf16, #tpu.memory_space<vmem>>, vector<1x8x64xbf16>
    %36 = vector.shape_cast %35 : vector<1x8x64xbf16> to vector<8x64xbf16>
    %cst_15 = arith.constant dense<0.000000e+00> : vector<64x64xf32>
    %37 = tpu.matmul %1, %36, %cst_15 {dimension_numbers = #tpu.dot_dimension_numbers<[1], [0], [0], [1], [0, 0, 1, 1], [], []>} : vector<64x8xbf16>, vector<8x64xbf16>, vector<64x64xf32> -> vector<64x64xf32>
    %c1_16 = arith.constant 1 : index
    %c0_17 = arith.constant 0 : index
    %c0_18 = arith.constant 0 : index
    %38 = vector.load %arg2[%c1_16, %c0_17, %c0_18] : memref<4x8x64xbf16, #tpu.memory_space<vmem>>, vector<1x8x64xbf16>
    %39 = vector.shape_cast %38 : vector<1x8x64xbf16> to vector<8x64xbf16>
    %cst_19 = arith.constant dense<0.000000e+00> : vector<64x64xf32>
    %40 = tpu.matmul %30, %39, %cst_19 {dimension_numbers = #tpu.dot_dimension_numbers<[1], [0], [0], [1], [0, 0, 1, 1], [], []>} : vector<64x8xbf16>, vector<8x64xbf16>, vector<64x64xf32> -> vector<64x64xf32>
    %41 = arith.addf %37, %40 : vector<64x64xf32>
    %c2 = arith.constant 2 : index
    %c0_20 = arith.constant 0 : index
    %c0_21 = arith.constant 0 : index
    %42 = vector.load %arg2[%c2, %c0_20, %c0_21] : memref<4x8x64xbf16, #tpu.memory_space<vmem>>, vector<1x8x64xbf16>
    %43 = vector.shape_cast %42 : vector<1x8x64xbf16> to vector<8x64xbf16>
    %cst_22 = arith.constant dense<0.000000e+00> : vector<64x64xf32>
    %44 = tpu.matmul %5, %43, %cst_22 {dimension_numbers = #tpu.dot_dimension_numbers<[1], [0], [0], [1], [0, 0, 1, 1], [], []>} : vector<64x8xbf16>, vector<8x64xbf16>, vector<64x64xf32> -> vector<64x64xf32>
    %45 = arith.addf %41, %44 : vector<64x64xf32>
    %c3 = arith.constant 3 : index
    %c0_23 = arith.constant 0 : index
    %c0_24 = arith.constant 0 : index
    %46 = vector.load %arg2[%c3, %c0_23, %c0_24] : memref<4x8x64xbf16, #tpu.memory_space<vmem>>, vector<1x8x64xbf16>
    %47 = vector.shape_cast %46 : vector<1x8x64xbf16> to vector<8x64xbf16>
    %cst_25 = arith.constant dense<0.000000e+00> : vector<64x64xf32>
    %48 = tpu.matmul %34, %47, %cst_25 {dimension_numbers = #tpu.dot_dimension_numbers<[1], [0], [0], [1], [0, 0, 1, 1], [], []>} : vector<64x8xbf16>, vector<8x64xbf16>, vector<64x64xf32> -> vector<64x64xf32>
    %49 = arith.addf %45, %48 : vector<64x64xf32>
    %cst_26 = arith.constant dense<0.000000e+00> : vector<64xf32>
    %50 = vector.multi_reduction <add>, %49, %cst_26 [0] : vector<64x64xf32> to vector<64xf32>
    %51 = vector.shape_cast %50 : vector<64xf32> to vector<1x64xf32>
    %cst_27 = arith.constant 1.562500e-02 : f32
    %52 = vector.broadcast %cst_27 : f32 to vector<1x64xf32>
    %53 = arith.mulf %51, %52 : vector<1x64xf32>
    %54 = vector.broadcast %53 : vector<1x64xf32> to vector<64x64xf32>
    %55 = arith.subf %49, %54 : vector<64x64xf32>
    %56 = arith.mulf %55, %55 : vector<64x64xf32>
    %cst_28 = arith.constant dense<0.000000e+00> : vector<64xf32>
    %57 = vector.multi_reduction <add>, %56, %cst_28 [0] : vector<64x64xf32> to vector<64xf32>
    %58 = vector.shape_cast %57 : vector<64xf32> to vector<1x64xf32>
    %c0_i32_29 = arith.constant 0 : i32
    %59 = arith.cmpi eq, %arg0, %c0_i32_29 : i32
    %60 = arith.extui %59 : i1 to i32
    %c0_i32_30 = arith.constant 0 : i32
    %61 = arith.cmpi ne, %60, %c0_i32_30 : i32
    scf.if %61 {
      %c0_33 = arith.constant 0 : index
      %c0_34 = arith.constant 0 : index
      %65 = vector.load %arg3[%c0_33, %c0_34] : memref<1x64xf32, #tpu.memory_space<vmem>>, vector<1x64xf32>
      tpu.vector_store %arg3[%c0_33, %c0_34], %53 {strides = array<i32>} : memref<1x64xf32, #tpu.memory_space<vmem>>, vector<1x64xf32>,
      %c0_35 = arith.constant 0 : index
      %c0_36 = arith.constant 0 : index
      %66 = vector.load %arg4[%c0_35, %c0_36] : memref<1x64xf32, #tpu.memory_space<vmem>>, vector<1x64xf32>
      tpu.vector_store %arg4[%c0_35, %c0_36], %58 {strides = array<i32>} : memref<1x64xf32, #tpu.memory_space<vmem>>, vector<1x64xf32>,
    } else {
    }
    %c0_i32_31 = arith.constant 0 : i32
    %62 = arith.cmpi sgt, %arg0, %c0_i32_31 : i32
    %63 = arith.extui %62 : i1 to i32
    %c0_i32_32 = arith.constant 0 : i32
    %64 = arith.cmpi ne, %63, %c0_i32_32 : i32
    scf.if %64 {
      %65 = arith.sitofp %arg0 : i32 to f32
      %cst_33 = arith.constant 6.400000e+01 : f32
      %66 = arith.mulf %65, %cst_33 : f32
      %cst_34 = arith.constant 6.400000e+01 : f32
      %67 = arith.addf %66, %cst_34 : f32
      %c0_35 = arith.constant 0 : index
      %c0_36 = arith.constant 0 : index
      %68 = vector.load %arg3[%c0_35, %c0_36] : memref<1x64xf32, #tpu.memory_space<vmem>>, vector<1x64xf32>
      %69 = arith.subf %53, %68 : vector<1x64xf32>
      %c0_37 = arith.constant 0 : index
      %c0_38 = arith.constant 0 : index
      %70 = vector.load %arg3[%c0_37, %c0_38] : memref<1x64xf32, #tpu.memory_space<vmem>>, vector<1x64xf32>
      %cst_39 = arith.constant 6.400000e+01 : f32
      %71 = arith.divf %cst_39, %67 : f32
      %72 = vector.broadcast %71 : f32 to vector<1x64xf32>
      %73 = arith.mulf %69, %72 : vector<1x64xf32>
      %74 = arith.addf %70, %73 : vector<1x64xf32>
      %c0_40 = arith.constant 0 : index
      %c0_41 = arith.constant 0 : index
      %75 = vector.load %arg3[%c0_40, %c0_41] : memref<1x64xf32, #tpu.memory_space<vmem>>, vector<1x64xf32>
      tpu.vector_store %arg3[%c0_40, %c0_41], %74 {strides = array<i32>} : memref<1x64xf32, #tpu.memory_space<vmem>>, vector<1x64xf32>,
      %c0_42 = arith.constant 0 : index
      %c0_43 = arith.constant 0 : index
      %76 = vector.load %arg4[%c0_42, %c0_43] : memref<1x64xf32, #tpu.memory_space<vmem>>, vector<1x64xf32>
      %77 = arith.addf %76, %58 : vector<1x64xf32>
      %78 = arith.mulf %69, %69 : vector<1x64xf32>
      %cst_44 = arith.constant 6.400000e+01 : f32
      %79 = arith.mulf %66, %cst_44 : f32
      %80 = arith.divf %79, %67 : f32
      %81 = vector.broadcast %80 : f32 to vector<1x64xf32>
      %82 = arith.mulf %78, %81 : vector<1x64xf32>
      %83 = arith.addf %77, %82 : vector<1x64xf32>
      %c0_45 = arith.constant 0 : index
      %c0_46 = arith.constant 0 : index
      %84 = vector.load %arg4[%c0_45, %c0_46] : memref<1x64xf32, #tpu.memory_space<vmem>>, vector<1x64xf32>
      tpu.vector_store %arg4[%c0_45, %c0_46], %83 {strides = array<i32>} : memref<1x64xf32, #tpu.memory_space<vmem>>, vector<1x64xf32>,
    } else {
    }
    return
  }
  func.func @transform_0(%arg0: i32) -> (i32, i32, i32) {
    %c0_i32 = arith.constant 0 : i32
    %c0_i32_0 = arith.constant 0 : i32
    %c0_i32_1 = arith.constant 0 : i32
    return %arg0, %c0_i32, %c0_i32_0 : i32, i32, i32
  }
  func.func @transform_1(%arg0: i32) -> (i32, i32, i32) {
    %c0_i32 = arith.constant 0 : i32
    %c0_i32_0 = arith.constant 0 : i32
    %c0_i32_1 = arith.constant 0 : i32
    %c0_i32_2 = arith.constant 0 : i32
    return %c0_i32, %c0_i32_0, %c0_i32_1 : i32, i32, i32
  }
  func.func @transform_2(%arg0: i32) -> (i32, i32) {
    %c0_i32 = arith.constant 0 : i32
    %c0_i32_0 = arith.constant 0 : i32
    %c0_i32_1 = arith.constant 0 : i32
    return %c0_i32, %c0_i32_0 : i32, i32
  }
  func.func @transform_3(%arg0: i32) -> (i32, i32) {
    %c0_i32 = arith.constant 0 : i32
    %c0_i32_0 = arith.constant 0 : i32
    %c0_i32_1 = arith.constant 0 : i32
    return %c0_i32, %c0_i32_0 : i32, i32
  }
}

module attributes {stable_mosaic.version = 11 : i64} {
  func.func @_normalize_kernel(%arg0: i32, %arg1: memref<1x88x8xbf16, #tpu.memory_space<vmem>>, %arg2: memref<4x8x64xbf16, #tpu.memory_space<vmem>>, %arg3: memref<1x64xf32, #tpu.memory_space<vmem>>, %arg4: memref<1x64xf32, #tpu.memory_space<vmem>>, %arg5: memref<64x64xf32, #tpu.memory_space<vmem>>) attributes {dimension_semantics = [#tpu.dimension_semantics<parallel>], iteration_bounds = array<i64: 8>, scalar_prefetch = 0 : i64, scratch_operands = 0 : i64, tpu.core_type = #tpu.core_type<tc>, window_params = [{transform_indices = @transform_0, window_bounds = array<i64: 1, 88, 8>}, {pipeline_mode = #tpu.pipeline_mode<synchronous>, transform_indices = @transform_1, window_bounds = array<i64: 4, 8, 64>}, {pipeline_mode = #tpu.pipeline_mode<synchronous>, transform_indices = @transform_2, window_bounds = array<i64: 1, 64>}, {pipeline_mode = #tpu.pipeline_mode<synchronous>, transform_indices = @transform_3, window_bounds = array<i64: 1, 64>}, {transform_indices = @transform_4, window_bounds = array<i64: 64, 64>}]} {
    %c0 = arith.constant 0 : index
    %c0_0 = arith.constant 0 : index
    %c0_1 = arith.constant 0 : index
    %0 = vector.load %arg1[%c0, %c0_0, %c0_1] : memref<1x88x8xbf16, #tpu.memory_space<vmem>>, vector<1x64x8xbf16>
    %1 = vector.shape_cast %0 : vector<1x64x8xbf16> to vector<64x8xbf16>
    %c0_2 = arith.constant 0 : index
    %c1 = arith.constant 1 : index
    %c0_3 = arith.constant 0 : index
    %2 = vector.load %arg1[%c0_2, %c1, %c0_3] : memref<1x88x8xbf16, #tpu.memory_space<vmem>>, vector<1x64x8xbf16>
    %3 = vector.shape_cast %2 : vector<1x64x8xbf16> to vector<64x8xbf16>
    %c0_4 = arith.constant 0 : index
    %c16 = arith.constant 16 : index
    %c0_5 = arith.constant 0 : index
    %4 = vector.load %arg1[%c0_4, %c16, %c0_5] : memref<1x88x8xbf16, #tpu.memory_space<vmem>>, vector<1x64x8xbf16>
    %5 = vector.shape_cast %4 : vector<1x64x8xbf16> to vector<64x8xbf16>
    %c0_6 = arith.constant 0 : index
    %c17 = arith.constant 17 : index
    %c0_7 = arith.constant 0 : index
    %6 = vector.load %arg1[%c0_6, %c17, %c0_7] : memref<1x88x8xbf16, #tpu.memory_space<vmem>>, vector<1x64x8xbf16>
    %7 = vector.shape_cast %6 : vector<1x64x8xbf16> to vector<64x8xbf16>
    %8 = tpu.iota {dimensions = array<i32: 0>} : vector<64x1xi32>
    %c16_i32 = arith.constant 16 : i32
    %c0_i32 = arith.constant 0 : i32
    %9 = arith.cmpi eq, %c16_i32, %c0_i32 : i32
    %c1_i32 = arith.constant 1 : i32
    %10 = arith.select %9, %c1_i32, %c16_i32 : i32
    %11 = vector.broadcast %10 : i32 to vector<64x1xi32>
    %12 = arith.remsi %8, %11 : vector<64x1xi32>
    %c0_i32_8 = arith.constant 0 : i32
    %13 = vector.broadcast %c0_i32_8 : i32 to vector<64x1xi32>
    %14 = arith.cmpi ne, %12, %13 : vector<64x1xi32>
    %c0_i32_9 = arith.constant 0 : i32
    %15 = vector.broadcast %c0_i32_9 : i32 to vector<64x1xi32>
    %16 = arith.cmpi slt, %12, %15 : vector<64x1xi32>
    %c0_i32_10 = arith.constant 0 : i32
    %17 = arith.cmpi slt, %10, %c0_i32_10 : i32
    %18 = vector.broadcast %17 : i1 to vector<64x1xi1>
    %19 = vector.broadcast %18 : vector<64x1xi1> to vector<64x1xi1>
    %20 = arith.xori %16, %19 : vector<64x1xi1>
    %21 = arith.andi %20, %14 : vector<64x1xi1>
    %22 = vector.broadcast %10 : i32 to vector<64x1xi32>
    %23 = arith.addi %12, %22 : vector<64x1xi32>
    %24 = arith.select %21, %23, %12 : vector<64x1xi1>, vector<64x1xi32>
    %c15_i32 = arith.constant 15 : i32
    %25 = vector.broadcast %c15_i32 : i32 to vector<64x1xi32>
    %26 = arith.cmpi ne, %24, %25 : vector<64x1xi32>
    %cst = arith.constant 0.000000e+00 : bf16
    %27 = vector.shape_cast %26 : vector<64x1xi1> to vector<64x1xi1>
    %28 = vector.broadcast %27 : vector<64x1xi1> to vector<64x8xi1>
    %29 = vector.broadcast %cst : bf16 to vector<64x8xbf16>
    %30 = arith.select %28, %3, %29 : vector<64x8xi1>, vector<64x8xbf16>
    %cst_11 = arith.constant 0.000000e+00 : bf16
    %31 = vector.shape_cast %26 : vector<64x1xi1> to vector<64x1xi1>
    %32 = vector.broadcast %31 : vector<64x1xi1> to vector<64x8xi1>
    %33 = vector.broadcast %cst_11 : bf16 to vector<64x8xbf16>
    %34 = arith.select %32, %7, %33 : vector<64x8xi1>, vector<64x8xbf16>
    %c0_12 = arith.constant 0 : index
    %c0_13 = arith.constant 0 : index
    %c0_14 = arith.constant 0 : index
    %35 = vector.load %arg2[%c0_12, %c0_13, %c0_14] : memref<4x8x64xbf16, #tpu.memory_space<vmem>>, vector<1x8x64xbf16>
    %36 = vector.shape_cast %35 : vector<1x8x64xbf16> to vector<8x64xbf16>
    %cst_15 = arith.constant dense<0.000000e+00> : vector<64x64xf32>
    %37 = tpu.matmul %1, %36, %cst_15 {dimension_numbers = #tpu.dot_dimension_numbers<[1], [0], [0], [1], [0, 0, 1, 1], [], []>} : vector<64x8xbf16>, vector<8x64xbf16>, vector<64x64xf32> -> vector<64x64xf32>
    %c1_16 = arith.constant 1 : index
    %c0_17 = arith.constant 0 : index
    %c0_18 = arith.constant 0 : index
    %38 = vector.load %arg2[%c1_16, %c0_17, %c0_18] : memref<4x8x64xbf16, #tpu.memory_space<vmem>>, vector<1x8x64xbf16>
    %39 = vector.shape_cast %38 : vector<1x8x64xbf16> to vector<8x64xbf16>
    %cst_19 = arith.constant dense<0.000000e+00> : vector<64x64xf32>
    %40 = tpu.matmul %30, %39, %cst_19 {dimension_numbers = #tpu.dot_dimension_numbers<[1], [0], [0], [1], [0, 0, 1, 1], [], []>} : vector<64x8xbf16>, vector<8x64xbf16>, vector<64x64xf32> -> vector<64x64xf32>
    %41 = arith.addf %37, %40 : vector<64x64xf32>
    %c2 = arith.constant 2 : index
    %c0_20 = arith.constant 0 : index
    %c0_21 = arith.constant 0 : index
    %42 = vector.load %arg2[%c2, %c0_20, %c0_21] : memref<4x8x64xbf16, #tpu.memory_space<vmem>>, vector<1x8x64xbf16>
    %43 = vector.shape_cast %42 : vector<1x8x64xbf16> to vector<8x64xbf16>
    %cst_22 = arith.constant dense<0.000000e+00> : vector<64x64xf32>
    %44 = tpu.matmul %5, %43, %cst_22 {dimension_numbers = #tpu.dot_dimension_numbers<[1], [0], [0], [1], [0, 0, 1, 1], [], []>} : vector<64x8xbf16>, vector<8x64xbf16>, vector<64x64xf32> -> vector<64x64xf32>
    %45 = arith.addf %41, %44 : vector<64x64xf32>
    %c3 = arith.constant 3 : index
    %c0_23 = arith.constant 0 : index
    %c0_24 = arith.constant 0 : index
    %46 = vector.load %arg2[%c3, %c0_23, %c0_24] : memref<4x8x64xbf16, #tpu.memory_space<vmem>>, vector<1x8x64xbf16>
    %47 = vector.shape_cast %46 : vector<1x8x64xbf16> to vector<8x64xbf16>
    %cst_25 = arith.constant dense<0.000000e+00> : vector<64x64xf32>
    %48 = tpu.matmul %34, %47, %cst_25 {dimension_numbers = #tpu.dot_dimension_numbers<[1], [0], [0], [1], [0, 0, 1, 1], [], []>} : vector<64x8xbf16>, vector<8x64xbf16>, vector<64x64xf32> -> vector<64x64xf32>
    %49 = arith.addf %45, %48 : vector<64x64xf32>
    %c0_26 = arith.constant 0 : index
    %c0_27 = arith.constant 0 : index
    %50 = vector.load %arg3[%c0_26, %c0_27] : memref<1x64xf32, #tpu.memory_space<vmem>>, vector<1x64xf32>
    %51 = vector.broadcast %50 : vector<1x64xf32> to vector<64x64xf32>
    %52 = arith.mulf %49, %51 : vector<64x64xf32>
    %c0_28 = arith.constant 0 : index
    %c0_29 = arith.constant 0 : index
    %53 = vector.load %arg4[%c0_28, %c0_29] : memref<1x64xf32, #tpu.memory_space<vmem>>, vector<1x64xf32>
    %54 = vector.broadcast %53 : vector<1x64xf32> to vector<64x64xf32>
    %55 = arith.addf %52, %54 : vector<64x64xf32>
    %cst_30 = arith.constant 0.000000e+00 : f32
    %56 = vector.broadcast %cst_30 : f32 to vector<64x64xf32>
    %57 = arith.maximumf %55, %56 : vector<64x64xf32>
    %c0_31 = arith.constant 0 : index
    %c0_32 = arith.constant 0 : index
    %58 = vector.load %arg5[%c0_31, %c0_32] : memref<64x64xf32, #tpu.memory_space<vmem>>, vector<64x64xf32>
    tpu.vector_store %arg5[%c0_31, %c0_32], %57 {strides = array<i32>} : memref<64x64xf32, #tpu.memory_space<vmem>>, vector<64x64xf32>,
    return
  }
  func.func @transform_0(%arg0: i32) -> (i32, i32, i32) {
    %c0_i32 = arith.constant 0 : i32
    %c0_i32_0 = arith.constant 0 : i32
    %c0_i32_1 = arith.constant 0 : i32
    return %arg0, %c0_i32, %c0_i32_0 : i32, i32, i32
  }
  func.func @transform_1(%arg0: i32) -> (i32, i32, i32) {
    %c0_i32 = arith.constant 0 : i32
    %c0_i32_0 = arith.constant 0 : i32
    %c0_i32_1 = arith.constant 0 : i32
    %c0_i32_2 = arith.constant 0 : i32
    return %c0_i32, %c0_i32_0, %c0_i32_1 : i32, i32, i32
  }
  func.func @transform_2(%arg0: i32) -> (i32, i32) {
    %c0_i32 = arith.constant 0 : i32
    %c0_i32_0 = arith.constant 0 : i32
    %c0_i32_1 = arith.constant 0 : i32
    return %c0_i32, %c0_i32_0 : i32, i32
  }
  func.func @transform_3(%arg0: i32) -> (i32, i32) {
    %c0_i32 = arith.constant 0 : i32
    %c0_i32_0 = arith.constant 0 : i32
    %c0_i32_1 = arith.constant 0 : i32
    return %c0_i32, %c0_i32_0 : i32, i32
  }
  func.func @transform_4(%arg0: i32) -> (i32, i32) {
    %c0_i32 = arith.constant 0 : i32
    %c0_i32_0 = arith.constant 0 : i32
    return %arg0, %c0_i32 : i32, i32
  }
}

</mosaic_0001>

<bundles_post_ra>
// kernel: tile.18
= control target key start
LH: loop header
LB: loop body
LE: loop exit
PB: predicated region body
PF: predicated region fallthrough
CT: control target
= control target key end

     0   :  { %s22_s0 = inlined_call_operand.vmem [shape: f32[16], index: 0, kind: input, shape index: {}]   ;;  %s23_s1 = inlined_call_operand.vmem [shape: f32[4,16], index: 1, kind: output, shape index: {}]  }
   0x1   :  { %v4_v0 = vld [vmem:[%s22_s0] ss:$0 sm:$0xff] }
   0x2   :  { %5 = vst [vmem:[%s23_s1] sm:$0xf] %v4_v0 }

// kernel: tile.19
= control target key start
LH: loop header
LB: loop body
LE: loop exit
PB: predicated region body
PF: predicated region fallthrough
CT: control target
= control target key end

     0   :  { %vm7_vm0 = vcmask 130048   ;;  %s37_s8 = smov 16   ;;  %s38_s9 = smov 32   ;;  %vm13_vm1 = vcmask 523648   ;;  %vm19_vm2 = vcmask 392448   ;;  %vm25_vm3 = vcmask 261248   ;;  %s55_s0 = inlined_call_operand.vmem [shape: f32[4,16], index: 0, kind: input, shape index: {}]   ;;  %s56_s1 = inlined_call_operand.vmem [shape: f32[1,64], index: 1, kind: output, shape index: {}]  }
   0x1   :  { %v4_v0 = vld [vmem:[%s55_s0] sm:$0xf]  ;;  %s36_s0 = smov 48  }
   0x2   :  { %5 = vst [vmem:[#allocation1] sm:$0xf] %v4_v0 }
   0x9   :  { %v10_v1 = vld [vmem:[#allocation1 + $0x3] sm:$0x1]   ;;  %v22_v2 = vld [vmem:[#allocation1 + $0x1] sm:$0x1]   ;;  %v6_v3 = vld [vmem:[#allocation1] sm:$0x1]  }
   0xa   :  { %11 = vrot.lane.b32.xlu0 %v10_v1, %s36_s0  ;;  %23 = vrot.lane.b32.xlu1 %v22_v2, %s37_s8  ;;  %v16_v4 = vld [vmem:[#allocation1 + $0x2] sm:$0x1]   ;;  %8 = vst.msk [vmem:[#allocation0] sm:$0x1] %vm7_vm0, %v6_v3  }
   0xe   :  { %17 = vrot.lane.b32.xlu0 %v16_v4, %s38_s9 }
  0x7c   :  { %v12_v5 = vpop.permute.xlu0 %11   ;;  %v24_v6 = vpop.permute.xlu1 %23  }
  0x7d   :  { %14 = vst.msk [vmem:[#allocation0] sm:$0x1] %vm13_vm1, %v12_v5  }
  0x80   :  { %v18_v7 = vpop.permute.xlu0 %17  }
  0x81   :  { %20 = vst.msk [vmem:[#allocation0] sm:$0x1] %vm19_vm2, %v18_v7  }
  0x82   :  { %26 = vst.msk [vmem:[#allocation0] sm:$0x1] %vm25_vm3, %v24_v6  }
  0x89   :  { %v30_v8 = vld [vmem:[#allocation0] sm:$0x1] }
  0x8a   :  { %32 = vst [vmem:[%s56_s1] sm:$0x1] %v30_v8 }

// kernel: upsampler_block.2
= control target key start
LH: loop header
LB: loop body
LE: loop exit
PB: predicated region body
PF: predicated region fallthrough
CT: control target
= control target key end

     0   :  { %s1207_s12 = smov 0   ;;  %s1469_s0 = inlined_call_operand.vmem [shape: bf16[8,88,8], index: 0, kind: input, shape index: {}]   ;;  %s1470_s1 = inlined_call_operand.vmem [shape: bf16[4,8,64], index: 1, kind: input, shape index: {}]   ;;  %s1471_s2 = inlined_call_operand.vmem [shape: f32[1,64], index: 2, kind: output, shape index: {0}]   ;;  %s1472_s3 = inlined_call_operand.vmem [shape: f32[1,64], index: 3, kind: output, shape index: {1}]  }
   0x1 LB: > { %s1213_s13 = sadd.s32 4294967295, %s1183_s12   ;;  %p1029_p0 = scmp.ge.s32.totalorder %s1183_s12, 1  ;;  %s1183_s12 = sphi %s1207_s12, %s14_s12  }
   0x2   : > { %p130_p1 = scmp.lt.s32.totalorder %s1183_s12, 9 }
   0x4   : > { %p131_p2 = pnand %p1029_p0, %p130_p1 }
   0x5   : > { %vm491_vm0 = vcmask (!%p131_p2), 1043456   ;;  %v1049_v0 = vld [vmem:[%s1470_s1 + $0x8] sm:$0xf] (!%p131_p2)  ;;  %p149_p3 = scmp.lt.s32.totalorder (!%p131_p2), %s1213_s13, 7  ;;  %v169_v1 = vlaneseq (!%p131_p2)  ;;  %vm1185_vm1 = vmmov (!%p131_p2), 1   ;;  %v1186_v4 = vmov (!%p131_p2), 0  }
   0x6   : > { %134 = sbr.rel (%p131_p2) target bundleno = 416 (0x1a0), region = 28  ;;  %1155 = vmatprep.subr.msk.bf16.mxu0 (!%p131_p2), %vm491_vm0, %v1049_v0  ;;  %v671_v2 = vsel (!%p131_p2), %vm491_vm0, %v1049_v0, 0  ;;  %vm298_vm2 = vmpackc.low (!%p131_p2), %vm1185_vm1, %vm1185_vm1  ;;  %v1031_v6 = vld [vmem:[%s1470_s1 + $0x4] sm:$0xf] (!%p131_p2)  ;;  %v1055_v10 = vld [vmem:[%s1470_s1 + $0xc] sm:$0xf] (!%p131_p2) }
   0x7   : > { %1110 = vmatpush3.bf16.msra.mxu0 (!%p131_p2), %v671_v2  ;;  %v170_v3 = vshrl.u32 (!%p131_p2), %v169_v1, 7  ;;  %v306_v5 = vsel (!%p131_p2), %vm298_vm2, 65537, %v1186_v4  ;;  %1153 = vmatprep.subr.msk.bf16.mxu1 (!%p131_p2), %vm491_vm0, %v1031_v6  ;;  %v493_v9 = vsel (!%p131_p2), %vm491_vm0, %v1031_v6, 0  ;;  %v1237_v16 = vld [vmem:[%s1470_s1] sm:$0xf] (!%p131_p2)  ;;  %vm478_vm6 = vcmask (!%p131_p2), 64512  }
   0x8   : > { %v318_v7 = vshrl.u32 (!%p131_p2), %v306_v5, 16  ;;  %v321_v8 = vshll.u32 (!%p131_p2), %v306_v5, 16  ;;  %1090 = vmatpush3.bf16.msra.mxu1 (!%p131_p2), %v493_v9  ;;  %1156 = vmatprep.subr.msk.bf16.mxu0 (!%p131_p2), %vm491_vm0, %v1055_v10  ;;  %vm314_vm3 = vsmask.f32 (!%p131_p2), 256  ;;  %vm315_vm8 = vsmask.f32 (!%p131_p2), 4368 }
   0x9   : > { %v171_v11 = vadd.s32 (!%p131_p2), 8, %v170_v3  ;;  %v173_v12 = vadd.s32 (!%p131_p2), 24, %v170_v3  ;;  %v175_v13 = vadd.s32 (!%p131_p2), 40, %v170_v3  ;;  %v177_v14 = vadd.s32 (!%p131_p2), 56, %v170_v3  ;;  %1154 = vmatprep.subr.msk.bf16.mxu1 (!%p131_p2), %vm491_vm0, %v1237_v16  ;;  %vm1317_vm15 = vmor (!%p131_p2), %vm314_vm3, %vm315_vm8  ;;  %p1065_p4 = scmp.ne.s32.totalorder (!%p131_p2), %s1213_s13, 0 }
   0xa   : > { %v320_v15 = vrot.slane (!%p131_p2), %v318_v7, 7  ;;  %v820_v31 = vsel (!%p131_p2), %vm491_vm0, %v1055_v10, 0 }
   0xb   : > { %v189_v17 = vand.u32 (!%p131_p2), 15, %v171_v11  ;;  %v203_v18 = vand.u32 (!%p131_p2), 15, %v173_v12  ;;  %v217_v20 = vand.u32 (!%p131_p2), 15, %v175_v13  ;;  %v231_v21 = vand.u32 (!%p131_p2), 15, %v177_v14 }
   0xc   : > { %v1258_v25 = vor.u32 (!%p131_p2), %v321_v8, %v320_v15  ;;  %v1301_v40 = vrot.slane (!%p131_p2), %v320_v15, 4 }
   0xd   : > { %s150_s16 = scalar_select %p149_p3, %s1213_s13, 7  ;;  %vm275_vm4 = vcmp.ne.s32.totalorder %v189_v17, 15  ;;  %vm1260_vm5 = vcmp.ne.s32.totalorder %v203_v18, 15  ;;  %vm279_vm10 = vcmp.ne.s32.totalorder %v217_v20, 15  ;;  %vm1290_vm11 = vcmp.ne.s32.totalorder %v231_v21, 15 }
   0xe   : > { %vm299_vm7 = vmpackc.low %vm275_vm4, %vm275_vm4  ;;  %vm388_vm12 = vcmp.ne.s16.totalorder %v1258_v25, 0  ;;  %vm441_vm4 = vsmask.f32 7424 }
   0xf   : > { %s1157_s21 = smul.u32 44, %s150_s16  ;;  %vm301_vm9 = vmpackc.low %vm1260_vm5, %vm1260_vm5  ;;  %v307_v33 = vsel %vm299_vm7, 65537, %v1186_v4 }
  0x10   : > { %v309_v36 = vsel %vm301_vm9, 65537, %v1186_v4  ;;  %v326_v37 = vshrl.u32 %v307_v33, 16  ;;  %v329_v38 = vshll.u32 %v307_v33, 16  ;;  %vm303_vm13 = vmpackc.low %vm279_vm10, %vm279_vm10 }
  0x11   : > { %s1242_s26 = scalar_lea.vmem %s1469_s0, %s1157_s21  ;;  %v344_v41 = vshrl.u32 %v309_v36, 16  ;;  %v347_v42 = vshll.u32 %v309_v36, 16  ;;  %v311_v43 = vsel %vm303_vm13, 65537, %v1186_v4  ;;  %vm305_vm14 = vmpackc.low %vm1290_vm11, %vm1290_vm11 }
  0x12   : > { %v1247_v19 = vld [vmem:[%s1242_s26 + $0x8] sm:$0xf]  ;;  %v1250_v22 = vld [vmem:[%s1242_s26 + $0xc] sm:$0xf]  ;;  %v1253_v23 = vld [vmem:[%s1242_s26 + $0x10] sm:$0xf] }
  0x13   : > { %v1256_v24 = vld [vmem:[%s1242_s26 + $0x14] sm:$0xf]  ;;  %v1265_v27 = vld [vmem:[%s1242_s26 + $0x18] sm:$0xf]  ;;  %v1269_v28 = vcombine.low %v1247_v19, %v1250_v22  ;;  %v1276_v30 = vld [vmem:[%s1242_s26 + $0x1c] sm:$0xf] }
  0x14   : > { %v1273_v29 = vcombine.low %v1253_v23, %v1256_v24  ;;  %v1280_v32 = vld [vmem:[%s1242_s26] sm:$0xf]  ;;  %v1288_v34 = vcombine.low %v1265_v27, %v1276_v30  ;;  %v1307_v44 = vld [vmem:[%s1242_s26 + $0x24] sm:$0xf]  ;;  %v328_v45 = vrot.slane %v326_v37, 7  ;;  %v362_v46 = vshrl.u32 %v311_v43, 16 }
  0x15   : > { %1111 = vmatprep.mubr.msk.bf16.mxu0 %vm478_vm6, %v1269_v28  ;;  %v1299_v39 = vld [vmem:[%s1242_s26 + $0x20] sm:$0xf]  ;;  %v365_v47 = vshll.u32 %v311_v43, 16  ;;  %v313_v48 = vsel %vm305_vm14, 65537, %v1186_v4  ;;  %v346_v50 = vrot.slane %v344_v41, 7  ;;  %v397_v51 = vsel %vm388_vm12, %v1280_v32, 0 }
  0x16   : > { %1112 = vmatmul.mubr.msk.bf16.vlgmr.msra.gmra.mrb[0].mxu0 %vm478_vm6, %v1273_v29  ;;  %v406_v52 = vsel %vm388_vm12, %v1247_v19, 0  ;;  %v380_v53 = vshrl.u32 %v313_v48, 16  ;;  %v331_v54 = vor.u32 %v329_v38, %v328_v45  ;;  %v333_v55 = vrot.slane %v328_v45, 4  ;;  %v1330_v58 = vld [vmem:[%s1242_s26 + $0x4] sm:$0xf] }
  0x17   : > { %1115 = vmatprep.mubr.msk.bf16.mxu0 %vm478_vm6, %v1288_v34  ;;  %1120 = vmatpush3.bf16.msra.mxu0 %v820_v31  ;;  %v364_v56 = vrot.slane %v362_v46, 7  ;;  %v1050_v57 = vcombine.low %v1299_v39, %v1307_v44  ;;  %v349_v59 = vor.u32 %v347_v42, %v346_v50  ;;  %v351_v60 = vrot.slane %v346_v50, 4 }
  0x18   : > { %v1332_v61 = vrot.slane %v380_v53, 7  ;;  %v383_v62 = vshll.u32 %v313_v48, 16  ;;  %v332_v63 = vsel %vm1317_vm15, %v1301_v40, %v331_v54  ;;  %v341_v0 = vsel %vm1317_vm15, %v333_v55, %v1258_v25 }
  0x19   : > { %v367_v1 = vor.u32 %v365_v47, %v364_v56  ;;  %v369_v2 = vrot.slane %v364_v56, 4  ;;  %v350_v3 = vsel %vm1317_vm15, %v1301_v40, %v349_v59  ;;  %vm1343_vm1 = vcmp.ne.s16.totalorder %v332_v63, 0 }
  0x1a   : > { %vm390_vm2 = vcmp.ne.s16.totalorder %v341_v0, 0  ;;  %v359_v5 = vsel %vm1317_vm15, %v351_v60, %v1258_v25  ;;  %vm391_vm3 = vcmp.ne.s16.totalorder %v350_v3, 0  ;;  %v398_v6 = vsel %vm1343_vm1, %v1330_v58, 0  ;;  %v165_v3 = vld [vmem:[%s1242_s26 + $0x20] sm:$0x1] }
  0x1b   : > { %v399_v7 = vsel %vm390_vm2, %v1247_v19, 0  ;;  %v407_v8 = vsel %vm1343_vm1, %v1250_v22, 0  ;;  %v400_v9 = vsel %vm391_vm3, %v1250_v22, 0  ;;  %v408_v10 = vsel %vm390_vm2, %v1253_v23, 0 }
  0x1c   : > { %v409_v11 = vsel %vm391_vm3, %v1256_v24, 0  ;;  %v1056_v12 = vcombine.low %v406_v52, %v407_v8  ;;  %v1033_v13 = vcombine.low %v399_v7, %v400_v9  ;;  %v368_v15 = vsel %vm1317_vm15, %v1301_v40, %v367_v1  ;;  %v168_v7 = vld [vmem:[%s1242_s26 + $0x28] sm:$0x1] }
  0x1d   : > { %v1057_v14 = vcombine.low %v408_v10, %v409_v11  ;;  %vm392_vm5 = vcmp.ne.s16.totalorder %v359_v5, 0  ;;  %vm1364_vm7 = vcmp.ne.s16.totalorder %v368_v15, 0  ;;  %v377_v26 = vsel %vm1317_vm15, %v369_v2, %v1258_v25 }
  0x1e   : > { %1116 = vmatmul.mubr.msk.bf16.gmra.mrb[4].mxu0 %vm478_vm6, %v1050_v57  ;;  %v772_v17 = vshrl.u32 %v1056_v12, 16  ;;  %v774_v18 = vshll.u32 %v1056_v12, 16  ;;  %v410_v20 = vsel %vm392_vm5, %v1265_v27, 0  ;;  %v411_v22 = vsel %vm1364_vm7, %v1276_v30, 0 }
  0x1f   : > { %v783_v21 = vshrl.u32 %v1057_v14, 16  ;;  %v385_v31 = vor.u32 %v383_v62, %v1332_v61  ;;  %v1058_v35 = vcombine.low %v410_v20, %v411_v22  ;;  %vm394_vm8 = vcmp.ne.s16.totalorder %v377_v26, 0 }
  0x20   : > { %v776_v33 = vrot.slane %v774_v18, 1  ;;  %v1032_v36 = vcombine.low %v397_v51, %v398_v6  ;;  %v412_v38 = vsel %vm394_vm8, %v1299_v39, 0  ;;  %v450_v41 = vshll.u32 %v1033_v13, 16 }
  0x21   : > { %v386_v37 = vsel %vm1317_vm15, %v1301_v40, %v385_v31  ;;  %v454_v42 = vshrl.u32 %v1033_v13, 16  ;;  %v779_v50 = vshll.u32 %v1057_v14, 16  ;;  %v401_v40 = vsel %vm392_vm5, %v1253_v23, 0 }
  0x22   : > { %vm1382_vm9 = vcmp.ne.s16.totalorder %v386_v37, 0  ;;  %v443_v25 = vshrl.u32 %v1032_v36, 16  ;;  %v445_v45 = vshll.u32 %v1032_v36, 16  ;;  %v777_v46 = vor.u32 %v776_v33, %v772_v17 }
  0x23   : > { %v413_v47 = vsel %vm1382_vm9, %v1307_v44, 0  ;;  %v452_v48 = vrot.slane %v450_v41, 1  ;;  %v402_v39 = vsel %vm1364_vm7, %v1256_v24, 0  ;;  %v787_v51 = vshll.u32 %v1058_v35, 16 }
  0x24   : > { %v447_v49 = vrot.slane %v445_v45, 1  ;;  %v403_v52 = vsel %vm394_vm8, %v1265_v27, 0  ;;  %v781_v54 = vrot.slane %v779_v50, 1  ;;  %v1034_v55 = vcombine.low %v401_v40, %v402_v39 }
  0x25   : > { %v456_v53 = vor.u32 %v454_v42, %v452_v48  ;;  %v404_v44 = vsel %vm1382_vm9, %v1276_v30, 0  ;;  %v789_v57 = vrot.slane %v787_v51, 1  ;;  %v1059_v59 = vcombine.low %v412_v38, %v413_v47 }
  0x26   : > { %v448_v56 = vor.u32 %v447_v49, %v443_v25  ;;  %v1035_v23 = vcombine.low %v403_v52, %v404_v44  ;;  %v782_v60 = vsel %vm441_vm4, %v777_v46, %v781_v54  ;;  %v785_v24 = vor.u32 %v783_v21, %v781_v54 }
  0x27   : > { %v458_v62 = vshll.u32 %v1034_v55, 16  ;;  %v462_v63 = vshrl.u32 %v1034_v55, 16  ;;  %1121 = vmatprep.mubr.msk.bf16.mxu0 %vm478_vm6, %v782_v60  ;;  %v791_v1 = vshrl.u32 %v1058_v35, 16  ;;  %v795_v2 = vshll.u32 %v1059_v59, 16 }
  0x28   : > { %v453_v27 = vsel %vm441_vm4, %v448_v56, %v452_v48  ;;  %v466_v0 = vshll.u32 %v1035_v23, 16  ;;  %v593_v4 = vsel %vm491_vm0, %v1237_v16, 0  ;;  %v790_v5 = vsel %vm441_vm4, %v785_v24, %v789_v57 }
  0x29   : > { %1091 = vmatprep.mubr.msk.bf16.mxu1 %vm478_vm6, %v453_v27  ;;  %v460_v30 = vrot.slane %v458_v62, 1  ;;  %v387_v6 = vrot.slane %v1332_v61, 4  ;;  %1122 = vmatmul.mubr.msk.bf16.vlgmr.msra.gmra.mrb[0].mxu0 %vm478_vm6, %v790_v5  ;;  %v793_v9 = vor.u32 %v791_v1, %v789_v57  ;;  %v797_v10 = vrot.slane %v795_v2, 1 }
  0x2a   : > { %v468_v8 = vrot.slane %v466_v0, 1  ;;  %v470_v11 = vshrl.u32 %v1035_v23, 16  ;;  %v799_v14 = vshrl.u32 %v1059_v59, 16  ;;  %v1041_v35 = vcombine.low %v1280_v32, %v1330_v58 }
  0x2b   : > { %v461_v12 = vsel %vm441_vm4, %v456_v53, %v460_v30  ;;  %v464_v13 = vor.u32 %v462_v63, %v460_v30  ;;  %vm396_vm10 = vcmp.ne.s16.totalorder %v387_v6, 0  ;;  %v798_v16 = vsel %vm441_vm4, %v793_v9, %v797_v10 }
  0x2c   : > { %1092 = vmatmul.mubr.msk.bf16.vlgmr.msra.gmra.mrb[0].mxu1 %vm478_vm6, %v461_v12  ;;  %v405_v15 = vsel %vm396_vm10, %v165_v3, 0  ;;  %v414_v17 = vsel %vm396_vm10, %v168_v7, 0  ;;  %1125 = vmatprep.mubr.msk.bf16.mxu0 %vm478_vm6, %v798_v16  ;;  %v472_v20 = vor.u32 %v470_v11, %v468_v8  ;;  %v801_v22 = vor.u32 %v799_v14, %v797_v10 }
  0x2d   : > { %1100 = vmatpush3.bf16.msra.mxu1 %v593_v4  ;;  %v469_v61 = vsel %vm441_vm4, %v464_v13, %v468_v8  ;;  %v1036_v18 = vcombine.low %v405_v15, %v405_v15  ;;  %v1060_v19 = vcombine.low %v414_v17, %v414_v17  ;;  %vm895_vm0 = vcmask 523264  }
  0x2e   : > { %1095 = vmatprep.mubr.msk.bf16.mxu1 %vm478_vm6, %v469_v61 }
  0x2f   : > { %v474_v21 = vshll.u32 %v1036_v18, 16  ;;  %v803_v26 = vshll.u32 %v1060_v19, 16 }
  0x31   : > { %v476_v31 = vrot.slane %v474_v21, 1  ;;  %v805_v33 = vrot.slane %v803_v26, 1 }
  0x33   : > { %v477_v36 = vsel %vm441_vm4, %v472_v20, %v476_v31  ;;  %v806_v37 = vsel %vm441_vm4, %v801_v22, %v805_v33 }
  0x34   : > { %1096 = vmatmul.mubr.msk.bf16.gmra.mrb[4].mxu1 %vm478_vm6, %v477_v36  ;;  %1126 = vmatmul.mubr.msk.bf16.gmra.mrb[4].mxu0 %vm478_vm6, %v806_v37 }
  0x35   : > { %1101 = vmatprep.mubr.msk.bf16.mxu1 %vm478_vm6, %v1041_v35 }
  0x3c   : > { %1102 = vmatmul.mubr.msk.bf16.vlgmr.msra.gmra.mrb[0].mxu1 %vm478_vm6, %v1269_v28 }
  0x3d   : > { %1105 = vmatprep.mubr.msk.bf16.mxu1 %vm478_vm6, %v1273_v29 }
  0x44   : > { %1106 = vmatmul.mubr.msk.bf16.gmra.mrb[4].mxu1 %vm478_vm6, %v1288_v34  ;;  %vm959_vm6 = vcmask (!%p1065_p4), 516096  }
  0xfc   : > { %v1123_v32 = vpop.f32.mrb[0].mxu0 }
  0xfd   : > { %v856_v58 = vpop.f32.mrb[1].mxu0 }
  0xfe   : > { %v1124_v38 = vpop.f32.mrb[2].mxu0 }
  0xff   : > { %v859_v41 = vpop.f32.mrb[3].mxu0 }
 0x107   : > { %v1127_v42 = vpop.f32.mrb[4].mxu0 }
 0x108   : > { %v872_v43 = vpop.f32.mrb[5].mxu0 }
 0x109   : > { %v1128_v25 = vpop.f32.mrb[6].mxu0 }
 0x10a   : > { %v875_v45 = vpop.f32.mrb[7].mxu0 }
 0x10f   : > { %v1103_v46 = vpop.f32.mrb[0].mxu1 }
 0x110   : > { %v1129_v47 = vadd.f32 %v1123_v32, %v1103_v46  ;;  %v629_v48 = vpop.f32.mrb[1].mxu1 }
 0x111   : > { %v1130_v50 = vadd.f32 %v856_v58, %v629_v48  ;;  %v1104_v40 = vpop.f32.mrb[2].mxu1 }
 0x112   : > { %v1131_v28 = vadd.f32 %v1124_v38, %v1104_v40  ;;  %v632_v49 = vpop.f32.mrb[3].mxu1  ;;  %v899_v52 = vsel %vm895_vm0, %v1129_v47, 0.0 }
 0x113   : > { %v1132_v29 = vadd.f32 %v859_v41, %v632_v49  ;;  %v896_v39 = vsel %vm895_vm0, %v1130_v50, 0.0 }
 0x114   : > { %v901_v56 = vsel %vm895_vm0, %v1131_v28, 0.0 }
 0x115   : > { %v897_v34 = vsel %vm895_vm0, %v1132_v29, 0.0 }
 0x116   : > { %v898_v51 = vadd.f32 %v897_v34, %v896_v39 }
 0x117   : > { %v1107_v53 = vpop.f32.mrb[4].mxu1 }
 0x118   : > { %v900_v54 = vadd.f32 %v899_v52, %v898_v51  ;;  %v1133_v55 = vadd.f32 %v1127_v42, %v1107_v53  ;;  %v645_v44 = vpop.f32.mrb[5].mxu1 }
 0x119   : > { %v1134_v57 = vadd.f32 %v872_v43, %v645_v44  ;;  %v1108_v23 = vpop.f32.mrb[6].mxu1 }
 0x11a   : > { %v902_v59 = vadd.f32 %v901_v56, %v900_v54  ;;  %v1135_v60 = vadd.f32 %v1128_v25, %v1108_v23  ;;  %v648_v24 = vpop.f32.mrb[7].mxu1  ;;  %v907_v2 = vsel %vm895_vm0, %v1133_v55, 0.0 }
 0x11b   : > { %v903_v62 = vsel %vm895_vm0, %v1134_v57, 0.0  ;;  %v1136_v63 = vadd.f32 %v875_v45, %v648_v24 }
 0x11c   : > { %v904_v27 = vadd.f32 %v903_v62, %v902_v59  ;;  %v909_v30 = vsel %vm895_vm0, %v1135_v60, 0.0 }
 0x11d   : > { %v905_v0 = vsel %vm895_vm0, %v1136_v63, 0.0 }
 0x11e   : > { %v906_v1 = vadd.f32 %v905_v0, %v904_v27 }
 0x120   : > { %v908_v3 = vadd.f32 %v907_v2, %v906_v1 }
 0x122   : > { %v910_v4 = vadd.f32 %v909_v30, %v908_v3 }
 0x124   : > { %v911_v5 = vrot.slane %v910_v4, 4 }
 0x126   : > { %v912_v6 = vadd.f32 %v911_v5, %v910_v4 }
 0x128   : > { %v913_v7 = vrot.slane %v912_v6, 2 }
 0x12a   : > { %v914_v8 = vadd.f32 %v913_v7, %v912_v6 }
 0x12c   : > { %v915_v9 = vrot.slane %v914_v8, 1 }
 0x12e   : > { %v916_v10 = vadd.f32 %v915_v9, %v914_v8 }
 0x130   : > { %v917_v11 = vmul.f32 0.015625, %v916_v10 }
 0x132   : > { %v918_v12 = vsub.f32 %v1130_v50, %v917_v11  ;;  %v919_v13 = vsub.f32 %v1132_v29, %v917_v11  ;;  %v920_v14 = vsub.f32 %v1129_v47, %v917_v11  ;;  %v921_v16 = vsub.f32 %v1131_v28, %v917_v11  ;;  %960 = vst.msk [vmem:[%s1471_s2] sm:$0x1] (!%p1065_p4), %vm959_vm6, %v917_v11 }
 0x133   : > { %v922_v15 = vsub.f32 %v1134_v57, %v917_v11  ;;  %v923_v17 = vsub.f32 %v1136_v63, %v917_v11  ;;  %v924_v61 = vsub.f32 %v1133_v55, %v917_v11  ;;  %v925_v18 = vsub.f32 %v1135_v60, %v917_v11 }
 0x134   : > { %v926_v19 = vmul.f32 %v918_v12, %v918_v12  ;;  %v927_v20 = vmul.f32 %v919_v13, %v919_v13  ;;  %v928_v21 = vmul.f32 %v920_v14, %v920_v14  ;;  %v929_v22 = vmul.f32 %v921_v16, %v921_v16 }
 0x135   : > { %v930_v35 = vmul.f32 %v922_v15, %v922_v15  ;;  %v931_v32 = vmul.f32 %v923_v17, %v923_v17  ;;  %v932_v41 = vmul.f32 %v924_v61, %v924_v61  ;;  %v933_v25 = vmul.f32 %v925_v18, %v925_v18 }
 0x136   : > { %v934_v26 = vsel %vm895_vm0, %v926_v19, 0.0  ;;  %v935_v31 = vsel %vm895_vm0, %v927_v20, 0.0  ;;  %v937_v36 = vsel %vm895_vm0, %v928_v21, 0.0  ;;  %v939_v58 = vsel %vm895_vm0, %v929_v22, 0.0 }
 0x137   : > { %v936_v33 = vadd.f32 %v935_v31, %v934_v26  ;;  %v941_v42 = vsel %vm895_vm0, %v930_v35, 0.0  ;;  %v943_v45 = vsel %vm895_vm0, %v931_v32, 0.0  ;;  %v945_v47 = vsel %vm895_vm0, %v932_v41, 0.0 }
 0x138   : > { %v947_v50 = vsel %vm895_vm0, %v933_v25, 0.0 }
 0x139   : > { %v938_v37 = vadd.f32 %v937_v36, %v936_v33 }
 0x13b   : > { %v940_v38 = vadd.f32 %v939_v58, %v938_v37 }
 0x13d   : > { %v942_v43 = vadd.f32 %v941_v42, %v940_v38 }
 0x13f   : > { %v944_v46 = vadd.f32 %v943_v45, %v942_v43 }
 0x141   : > { %v946_v48 = vadd.f32 %v945_v47, %v944_v46 }
 0x143   : > { %v948_v40 = vadd.f32 %v947_v50, %v946_v48 }
 0x145   : > { %v949_v28 = vrot.slane %v948_v40, 4 }
 0x147   : > { %v950_v49 = vadd.f32 %v949_v28, %v948_v40 }
 0x149   : > { %v951_v29 = vrot.slane %v950_v49, 2  ;;  %958 = sbr.rel (%p1065_p4) target bundleno = 338 (0x152), region = 32 }
 0x14b   : > { %v952_v39 = vadd.f32 %v951_v29, %v950_v49 }
 0x14d   : > { %v953_v34 = vrot.slane %v952_v39, 1 }
 0x14f   : > { %v954_v51 = vadd.f32 %v953_v34, %v952_v39 }
 0x151   : > { %961 = vst.msk [vmem:[%s1472_s3] sm:$0x1] %vm959_vm6, %v954_v51 }
 0x152 PF: > { %p1066_p5 = scmp.le.s32.totalorder %s1213_s13, 0 }
 0x153   : > { %s966_s4 = scvt.s32.f32 (!%p1066_p5), %s1213_s13  ;;  %v969_v54 = vld [vmem:[%s1471_s2] sm:$0x1] (!%p1066_p5)  ;;  %vm978_vm11 = vcmask (!%p1066_p5), 516096  }
 0x154   : > { %965 = sbr.rel (%p1066_p5) target bundleno = 416 (0x1a0), region = 36  ;;  %v970_v55 = vsub.f32 (!%p1066_p5), %v917_v11, %v969_v54 }
 0x155   : > { %s967_s5 = smul.f32 (!%p1066_p5), 64.0, %s966_s4 }
 0x156   : > { %v982_v56 = vmul.f32 (!%p1066_p5), %v970_v55, %v970_v55 }
 0x157   : > { %s968_s6 = sadd.f32 (!%p1066_p5), 64.0, %s967_s5  ;;  %s983_s9 = smul.f32 (!%p1066_p5), 64.0, %s967_s5 }
 0x158   : > { %v980_v44 = vld [vmem:[%s1472_s3] sm:$0x1] (!%p1066_p5) }
 0x159   : > { %v971_v52 = vstv (!%p1066_p5), %s968_s6  ;;  %v981_v23 = vadd.f32 (!%p1066_p5), %v980_v44, %v954_v51 }
 0x15a   : > { %1175 = vrcp.f32 (!%p1066_p5), %v971_v52 }
 0x164   : > { %v1176_v53 = vpop.eup %1175 }
 0x165   : > { %1158 = vpush %v1176_v53 }
 0x196   : > { %s1159_s10 = spop %1158 }
 0x197   : > { %s974_s15 = smul.f32 64.0, %s1159_s10 }
 0x198   : > { %s987_s13 = smul.f32 %s1159_s10, %s983_s9 }
 0x199   : > { %v975_v57 = vstv %s974_s15 }
 0x19a   : > { %v976_v59 = vmul.f32 %v975_v57, %v970_v55  ;;  %v988_v60 = vstv %s987_s13 }
 0x19b   : > { %v989_v24 = vmul.f32 %v988_v60, %v982_v56 }
 0x19c   : > { %v977_v62 = vadd.f32 %v976_v59, %v969_v54 }
 0x19d   : > { %v990_v63 = vadd.f32 %v989_v24, %v981_v23 }
 0x19e   : > { %979 = vst.msk [vmem:[%s1471_s2] sm:$0x1] %vm978_vm11, %v977_v62 }
 0x19f   : > { %991 = vst.msk [vmem:[%s1472_s3] sm:$0x1] %vm978_vm11, %v990_v63 }
 0x1a0 PF: > { %s14_s12 = sadd.s32 1, %s1183_s12  }
 0x1a1   : > { %p11_p6 = scmp.ge.s32.totalorder %s14_s12, 10  }
 0x1a3   :  { %13 = sbr.rel (!%p11_p6) target bundleno = 1 (0x1), region = 73 }

// kernel: upsampler_block.3
= control target key start
LH: loop header
LB: loop body
LE: loop exit
PB: predicated region body
PF: predicated region fallthrough
CT: control target
= control target key end

     0   :  { %s1228_s15 = smov 0   ;;  %s1481_s0 = inlined_call_operand.vmem [shape: bf16[8,88,8], index: 0, kind: input, shape index: {}]   ;;  %s1482_s1 = inlined_call_operand.vmem [shape: bf16[4,8,64], index: 1, kind: input, shape index: {}]   ;;  %s1483_s2 = inlined_call_operand.vmem [shape: f32[1,64], index: 2, kind: input, shape index: {}]   ;;  %s1484_s3 = inlined_call_operand.vmem [shape: f32[1,64], index: 3, kind: input, shape index: {}]   ;;  %s1485_s4 = inlined_call_operand.vmem [shape: f32[512,64], index: 4, kind: output, shape index: {}]  }
   0x1 LB: > { %s1234_s16 = sadd.s32 4294967295, %s1199_s15   ;;  %p1047_p0 = scmp.ge.s32.totalorder %s1199_s15, 1  ;;  %s1199_s15 = sphi %s1228_s15, %s14_s15  }
   0x2   : > { %p162_p1 = scmp.lt.s32.totalorder %s1199_s15, 9 }
   0x4   : > { %p163_p2 = pnand %p1047_p0, %p162_p1 }
   0x5   : > { %vm536_vm0 = vcmask (!%p163_p2), 1043456   ;;  %v1069_v0 = vld [vmem:[%s1482_s1 + $0x8] sm:$0xf] (!%p163_p2)  ;;  %p188_p3 = scmp.lt.s32.totalorder (!%p163_p2), %s1234_s16, 7  ;;  %v214_v1 = vlaneseq (!%p163_p2)  ;;  %vm1201_vm1 = vmmov (!%p163_p2), 1   ;;  %v1202_v4 = vmov (!%p163_p2), 0  }
   0x6   : > { %166 = sbr.rel (%p163_p2) target bundleno = 292 (0x124), region = 36  ;;  %1175 = vmatprep.subr.msk.bf16.mxu0 (!%p163_p2), %vm536_vm0, %v1069_v0  ;;  %v716_v2 = vsel (!%p163_p2), %vm536_vm0, %v1069_v0, 0  ;;  %vm343_vm2 = vmpackc.low (!%p163_p2), %vm1201_vm1, %vm1201_vm1  ;;  %v1051_v6 = vld [vmem:[%s1482_s1 + $0x4] sm:$0xf] (!%p163_p2)  ;;  %v1075_v10 = vld [vmem:[%s1482_s1 + $0xc] sm:$0xf] (!%p163_p2) }
   0x7   : > { %1130 = vmatpush3.bf16.msra.mxu0 (!%p163_p2), %v716_v2  ;;  %v215_v3 = vshrl.u32 (!%p163_p2), %v214_v1, 7  ;;  %v351_v5 = vsel (!%p163_p2), %vm343_vm2, 65537, %v1202_v4  ;;  %1173 = vmatprep.subr.msk.bf16.mxu1 (!%p163_p2), %vm536_vm0, %v1051_v6  ;;  %v538_v9 = vsel (!%p163_p2), %vm536_vm0, %v1051_v6, 0  ;;  %v1258_v16 = vld [vmem:[%s1482_s1] sm:$0xf] (!%p163_p2)  ;;  %vm523_vm6 = vcmask (!%p163_p2), 64512  }
   0x8   : > { %v363_v7 = vshrl.u32 (!%p163_p2), %v351_v5, 16  ;;  %v366_v8 = vshll.u32 (!%p163_p2), %v351_v5, 16  ;;  %1110 = vmatpush3.bf16.msra.mxu1 (!%p163_p2), %v538_v9  ;;  %1176 = vmatprep.subr.msk.bf16.mxu0 (!%p163_p2), %vm536_vm0, %v1075_v10  ;;  %vm359_vm3 = vsmask.f32 (!%p163_p2), 256  ;;  %vm360_vm8 = vsmask.f32 (!%p163_p2), 4368 }
   0x9   : > { %v216_v11 = vadd.s32 (!%p163_p2), 8, %v215_v3  ;;  %v218_v12 = vadd.s32 (!%p163_p2), 24, %v215_v3  ;;  %v220_v13 = vadd.s32 (!%p163_p2), 40, %v215_v3  ;;  %v222_v14 = vadd.s32 (!%p163_p2), 56, %v215_v3  ;;  %1174 = vmatprep.subr.msk.bf16.mxu1 (!%p163_p2), %vm536_vm0, %v1258_v16  ;;  %vm1338_vm15 = vmor (!%p163_p2), %vm359_vm3, %vm360_vm8  ;;  %s1049_s30 = sshll.u32 (!%p163_p2), %s1234_s16, 3 }
   0xa   : > { %v365_v15 = vrot.slane (!%p163_p2), %v363_v7, 7  ;;  %v865_v31 = vsel (!%p163_p2), %vm536_vm0, %v1075_v10, 0  ;;  %p194_p4 = scmp.lt.s32.totalorder (!%p163_p2), %s1049_s30, 63 }
   0xb   : > { %v234_v17 = vand.u32 (!%p163_p2), 15, %v216_v11  ;;  %v248_v18 = vand.u32 (!%p163_p2), 15, %v218_v12  ;;  %v262_v20 = vand.u32 (!%p163_p2), 15, %v220_v13  ;;  %v276_v21 = vand.u32 (!%p163_p2), 15, %v222_v14 }
   0xc   : > { %v1279_v25 = vor.u32 (!%p163_p2), %v366_v8, %v365_v15  ;;  %v1322_v40 = vrot.slane (!%p163_p2), %v365_v15, 4 }
   0xd   : > { %s189_s19 = scalar_select %p188_p3, %s1234_s16, 7  ;;  %vm320_vm4 = vcmp.ne.s32.totalorder %v234_v17, 15  ;;  %vm1281_vm5 = vcmp.ne.s32.totalorder %v248_v18, 15  ;;  %vm324_vm10 = vcmp.ne.s32.totalorder %v262_v20, 15  ;;  %vm1311_vm11 = vcmp.ne.s32.totalorder %v276_v21, 15 }
   0xe   : > { %vm344_vm7 = vmpackc.low %vm320_vm4, %vm320_vm4  ;;  %vm433_vm12 = vcmp.ne.s16.totalorder %v1279_v25, 0  ;;  %vm486_vm4 = vsmask.f32 7424  ;;  %s1499_s30 = smov (!%p194_p4, %s1049_s30), 63 }
   0xf   : > { %s1177_s24 = smul.u32 44, %s189_s19  ;;  %vm346_vm9 = vmpackc.low %vm1281_vm5, %vm1281_vm5  ;;  %v352_v33 = vsel %vm344_vm7, 65537, %v1202_v4  ;;  %s1050_s9 = sshll.u32 %s1499_s30, 3 }
  0x10   : > { %v354_v36 = vsel %vm346_vm9, 65537, %v1202_v4  ;;  %v371_v37 = vshrl.u32 %v352_v33, 16  ;;  %v374_v38 = vshll.u32 %v352_v33, 16  ;;  %vm348_vm13 = vmpackc.low %vm324_vm10, %vm324_vm10  ;;  %s1460_s12 = scalar_lea.vmem %s1485_s4, %s1050_s9 }
  0x11   : > { %s1263_s29 = scalar_lea.vmem %s1481_s0, %s1177_s24  ;;  %v389_v41 = vshrl.u32 %v354_v36, 16  ;;  %v392_v42 = vshll.u32 %v354_v36, 16  ;;  %v356_v43 = vsel %vm348_vm13, 65537, %v1202_v4  ;;  %vm350_vm14 = vmpackc.low %vm1311_vm11, %vm1311_vm11 }
  0x12   : > { %v1268_v19 = vld [vmem:[%s1263_s29 + $0x8] sm:$0xf]  ;;  %v1271_v22 = vld [vmem:[%s1263_s29 + $0xc] sm:$0xf]  ;;  %v1274_v23 = vld [vmem:[%s1263_s29 + $0x10] sm:$0xf] }
  0x13   : > { %v1277_v24 = vld [vmem:[%s1263_s29 + $0x14] sm:$0xf]  ;;  %v1286_v27 = vld [vmem:[%s1263_s29 + $0x18] sm:$0xf]  ;;  %v1290_v28 = vcombine.low %v1268_v19, %v1271_v22  ;;  %v1297_v30 = vld [vmem:[%s1263_s29 + $0x1c] sm:$0xf] }
  0x14   : > { %v1294_v29 = vcombine.low %v1274_v23, %v1277_v24  ;;  %v1301_v32 = vld [vmem:[%s1263_s29] sm:$0xf]  ;;  %v1309_v34 = vcombine.low %v1286_v27, %v1297_v30  ;;  %v1328_v44 = vld [vmem:[%s1263_s29 + $0x24] sm:$0xf]  ;;  %v373_v45 = vrot.slane %v371_v37, 7  ;;  %v407_v46 = vshrl.u32 %v356_v43, 16 }
  0x15   : > { %1131 = vmatprep.mubr.msk.bf16.mxu0 %vm523_vm6, %v1290_v28  ;;  %v1320_v39 = vld [vmem:[%s1263_s29 + $0x20] sm:$0xf]  ;;  %v410_v47 = vshll.u32 %v356_v43, 16  ;;  %v358_v48 = vsel %vm350_vm14, 65537, %v1202_v4  ;;  %v391_v50 = vrot.slane %v389_v41, 7  ;;  %v442_v51 = vsel %vm433_vm12, %v1301_v32, 0 }
  0x16   : > { %1132 = vmatmul.mubr.msk.bf16.vlgmr.msra.gmra.mrb[0].mxu0 %vm523_vm6, %v1294_v29  ;;  %v451_v52 = vsel %vm433_vm12, %v1268_v19, 0  ;;  %v425_v53 = vshrl.u32 %v358_v48, 16  ;;  %v376_v54 = vor.u32 %v374_v38, %v373_v45  ;;  %v378_v55 = vrot.slane %v373_v45, 4  ;;  %v1351_v58 = vld [vmem:[%s1263_s29 + $0x4] sm:$0xf] }
  0x17   : > { %1135 = vmatprep.mubr.msk.bf16.mxu0 %vm523_vm6, %v1309_v34  ;;  %1140 = vmatpush3.bf16.msra.mxu0 %v865_v31  ;;  %v409_v56 = vrot.slane %v407_v46, 7  ;;  %v1070_v57 = vcombine.low %v1320_v39, %v1328_v44  ;;  %v394_v59 = vor.u32 %v392_v42, %v391_v50  ;;  %v396_v60 = vrot.slane %v391_v50, 4 }
  0x18   : > { %v1353_v61 = vrot.slane %v425_v53, 7  ;;  %v428_v62 = vshll.u32 %v358_v48, 16  ;;  %v377_v63 = vsel %vm1338_vm15, %v1322_v40, %v376_v54  ;;  %v386_v0 = vsel %vm1338_vm15, %v378_v55, %v1279_v25 }
  0x19   : > { %v412_v1 = vor.u32 %v410_v47, %v409_v56  ;;  %v414_v2 = vrot.slane %v409_v56, 4  ;;  %v395_v3 = vsel %vm1338_vm15, %v1322_v40, %v394_v59  ;;  %vm1364_vm1 = vcmp.ne.s16.totalorder %v377_v63, 0 }
  0x1a   : > { %vm435_vm2 = vcmp.ne.s16.totalorder %v386_v0, 0  ;;  %v404_v5 = vsel %vm1338_vm15, %v396_v60, %v1279_v25  ;;  %vm436_vm3 = vcmp.ne.s16.totalorder %v395_v3, 0  ;;  %v443_v6 = vsel %vm1364_vm1, %v1351_v58, 0  ;;  %v210_v3 = vld [vmem:[%s1263_s29 + $0x20] sm:$0x1] }
  0x1b   : > { %v444_v7 = vsel %vm435_vm2, %v1268_v19, 0  ;;  %v452_v8 = vsel %vm1364_vm1, %v1271_v22, 0  ;;  %v445_v9 = vsel %vm436_vm3, %v1271_v22, 0  ;;  %v453_v10 = vsel %vm435_vm2, %v1274_v23, 0 }
  0x1c   : > { %v454_v11 = vsel %vm436_vm3, %v1277_v24, 0  ;;  %v1076_v12 = vcombine.low %v451_v52, %v452_v8  ;;  %v1053_v13 = vcombine.low %v444_v7, %v445_v9  ;;  %v413_v15 = vsel %vm1338_vm15, %v1322_v40, %v412_v1  ;;  %v213_v7 = vld [vmem:[%s1263_s29 + $0x28] sm:$0x1] }
  0x1d   : > { %v1077_v14 = vcombine.low %v453_v10, %v454_v11  ;;  %vm437_vm5 = vcmp.ne.s16.totalorder %v404_v5, 0  ;;  %vm1385_vm7 = vcmp.ne.s16.totalorder %v413_v15, 0  ;;  %v422_v26 = vsel %vm1338_vm15, %v414_v2, %v1279_v25 }
  0x1e   : > { %1136 = vmatmul.mubr.msk.bf16.gmra.mrb[4].mxu0 %vm523_vm6, %v1070_v57  ;;  %v817_v17 = vshrl.u32 %v1076_v12, 16  ;;  %v819_v18 = vshll.u32 %v1076_v12, 16  ;;  %v455_v20 = vsel %vm437_vm5, %v1286_v27, 0  ;;  %v456_v22 = vsel %vm1385_vm7, %v1297_v30, 0 }
  0x1f   : > { %v828_v21 = vshrl.u32 %v1077_v14, 16  ;;  %v430_v31 = vor.u32 %v428_v62, %v1353_v61  ;;  %v1078_v35 = vcombine.low %v455_v20, %v456_v22  ;;  %vm439_vm8 = vcmp.ne.s16.totalorder %v422_v26, 0 }
  0x20   : > { %v821_v33 = vrot.slane %v819_v18, 1  ;;  %v1052_v36 = vcombine.low %v442_v51, %v443_v6  ;;  %v457_v38 = vsel %vm439_vm8, %v1320_v39, 0  ;;  %v495_v41 = vshll.u32 %v1053_v13, 16 }
  0x21   : > { %v431_v37 = vsel %vm1338_vm15, %v1322_v40, %v430_v31  ;;  %v499_v42 = vshrl.u32 %v1053_v13, 16  ;;  %v824_v50 = vshll.u32 %v1077_v14, 16  ;;  %v446_v40 = vsel %vm437_vm5, %v1274_v23, 0 }
  0x22   : > { %vm1403_vm9 = vcmp.ne.s16.totalorder %v431_v37, 0  ;;  %v488_v25 = vshrl.u32 %v1052_v36, 16  ;;  %v490_v45 = vshll.u32 %v1052_v36, 16  ;;  %v822_v46 = vor.u32 %v821_v33, %v817_v17 }
  0x23   : > { %v458_v47 = vsel %vm1403_vm9, %v1328_v44, 0  ;;  %v497_v48 = vrot.slane %v495_v41, 1  ;;  %v447_v39 = vsel %vm1385_vm7, %v1277_v24, 0  ;;  %v832_v51 = vshll.u32 %v1078_v35, 16 }
  0x24   : > { %v492_v49 = vrot.slane %v490_v45, 1  ;;  %v448_v52 = vsel %vm439_vm8, %v1286_v27, 0  ;;  %v826_v54 = vrot.slane %v824_v50, 1  ;;  %v1054_v55 = vcombine.low %v446_v40, %v447_v39 }
  0x25   : > { %v501_v53 = vor.u32 %v499_v42, %v497_v48  ;;  %v449_v44 = vsel %vm1403_vm9, %v1297_v30, 0  ;;  %v834_v57 = vrot.slane %v832_v51, 1  ;;  %v1079_v59 = vcombine.low %v457_v38, %v458_v47 }
  0x26   : > { %v493_v56 = vor.u32 %v492_v49, %v488_v25  ;;  %v1055_v23 = vcombine.low %v448_v52, %v449_v44  ;;  %v827_v60 = vsel %vm486_vm4, %v822_v46, %v826_v54  ;;  %v830_v24 = vor.u32 %v828_v21, %v826_v54 }
  0x27   : > { %v503_v62 = vshll.u32 %v1054_v55, 16  ;;  %v507_v63 = vshrl.u32 %v1054_v55, 16  ;;  %1141 = vmatprep.mubr.msk.bf16.mxu0 %vm523_vm6, %v827_v60  ;;  %v836_v1 = vshrl.u32 %v1078_v35, 16  ;;  %v840_v2 = vshll.u32 %v1079_v59, 16 }
  0x28   : > { %v498_v27 = vsel %vm486_vm4, %v493_v56, %v497_v48  ;;  %v511_v0 = vshll.u32 %v1055_v23, 16  ;;  %v638_v4 = vsel %vm536_vm0, %v1258_v16, 0  ;;  %v835_v5 = vsel %vm486_vm4, %v830_v24, %v834_v57 }
  0x29   : > { %1111 = vmatprep.mubr.msk.bf16.mxu1 %vm523_vm6, %v498_v27  ;;  %v505_v30 = vrot.slane %v503_v62, 1  ;;  %v432_v6 = vrot.slane %v1353_v61, 4  ;;  %1142 = vmatmul.mubr.msk.bf16.vlgmr.msra.gmra.mrb[0].mxu0 %vm523_vm6, %v835_v5  ;;  %v838_v9 = vor.u32 %v836_v1, %v834_v57  ;;  %v842_v10 = vrot.slane %v840_v2, 1 }
  0x2a   : > { %v513_v8 = vrot.slane %v511_v0, 1  ;;  %v515_v11 = vshrl.u32 %v1055_v23, 16  ;;  %v844_v14 = vshrl.u32 %v1079_v59, 16  ;;  %v1061_v35 = vcombine.low %v1301_v32, %v1351_v58 }
  0x2b   : > { %v506_v12 = vsel %vm486_vm4, %v501_v53, %v505_v30  ;;  %v509_v13 = vor.u32 %v507_v63, %v505_v30  ;;  %vm441_vm10 = vcmp.ne.s16.totalorder %v432_v6, 0  ;;  %v843_v16 = vsel %vm486_vm4, %v838_v9, %v842_v10 }
  0x2c   : > { %1112 = vmatmul.mubr.msk.bf16.vlgmr.msra.gmra.mrb[0].mxu1 %vm523_vm6, %v506_v12  ;;  %v450_v15 = vsel %vm441_vm10, %v210_v3, 0  ;;  %v459_v17 = vsel %vm441_vm10, %v213_v7, 0  ;;  %1145 = vmatprep.mubr.msk.bf16.mxu0 %vm523_vm6, %v843_v16  ;;  %v517_v20 = vor.u32 %v515_v11, %v513_v8  ;;  %v846_v22 = vor.u32 %v844_v14, %v842_v10 }
  0x2d   : > { %1120 = vmatpush3.bf16.msra.mxu1 %v638_v4  ;;  %v514_v61 = vsel %vm486_vm4, %v509_v13, %v513_v8  ;;  %v1056_v18 = vcombine.low %v450_v15, %v450_v15  ;;  %v1080_v19 = vcombine.low %v459_v17, %v459_v17  ;;  %vm978_vm0 = vcmask 523264  }
  0x2e   : > { %1115 = vmatprep.mubr.msk.bf16.mxu1 %vm523_vm6, %v514_v61 }
  0x2f   : > { %v519_v21 = vshll.u32 %v1056_v18, 16  ;;  %v848_v26 = vshll.u32 %v1080_v19, 16 }
  0x31   : > { %v521_v31 = vrot.slane %v519_v21, 1  ;;  %v850_v33 = vrot.slane %v848_v26, 1 }
  0x33   : > { %v522_v36 = vsel %vm486_vm4, %v517_v20, %v521_v31  ;;  %v851_v37 = vsel %vm486_vm4, %v846_v22, %v850_v33 }
  0x34   : > { %1116 = vmatmul.mubr.msk.bf16.gmra.mrb[4].mxu1 %vm523_vm6, %v522_v36  ;;  %1146 = vmatmul.mubr.msk.bf16.gmra.mrb[4].mxu0 %vm523_vm6, %v851_v37 }
  0x35   : > { %1121 = vmatprep.mubr.msk.bf16.mxu1 %vm523_vm6, %v1061_v35 }
  0x3c   : > { %1122 = vmatmul.mubr.msk.bf16.vlgmr.msra.gmra.mrb[0].mxu1 %vm523_vm6, %v1290_v28  ;;  %v1085_v28 = vld [vmem:[%s1483_s2] ss:$0 sm:$0xff] }
  0x3d   : > { %1125 = vmatprep.mubr.msk.bf16.mxu1 %vm523_vm6, %v1294_v29 }
  0x44   : > { %1126 = vmatmul.mubr.msk.bf16.gmra.mrb[4].mxu1 %vm523_vm6, %v1309_v34  ;;  %v1086_v34 = vld [vmem:[%s1484_s3] ss:$0 sm:$0xff] }
  0xfc   : > { %v1143_v32 = vpop.f32.mrb[0].mxu0 }
  0xfd   : > { %v901_v58 = vpop.f32.mrb[1].mxu0 }
  0xfe   : > { %v1144_v38 = vpop.f32.mrb[2].mxu0 }
  0xff   : > { %v904_v41 = vpop.f32.mrb[3].mxu0 }
 0x107   : > { %v1147_v42 = vpop.f32.mrb[4].mxu0 }
 0x108   : > { %v917_v43 = vpop.f32.mrb[5].mxu0 }
 0x109   : > { %v1148_v25 = vpop.f32.mrb[6].mxu0 }
 0x10a   : > { %v920_v45 = vpop.f32.mrb[7].mxu0 }
 0x10f   : > { %v1123_v46 = vpop.f32.mrb[0].mxu1 }
 0x110   : > { %v1149_v29 = vadd.f32 %v1143_v32, %v1123_v46  ;;  %v674_v47 = vpop.f32.mrb[1].mxu1 }
 0x111   : > { %v1150_v48 = vadd.f32 %v901_v58, %v674_v47  ;;  %v1124_v50 = vpop.f32.mrb[2].mxu1 }
 0x112   : > { %v949_v40 = vmul.f32 %v1149_v29, %v1085_v28  ;;  %v1151_v49 = vadd.f32 %v1144_v38, %v1124_v50  ;;  %v677_v39 = vpop.f32.mrb[3].mxu1 }
 0x113   : > { %v947_v51 = vmul.f32 %v1150_v48, %v1085_v28  ;;  %v1152_v52 = vadd.f32 %v904_v41, %v677_v39 }
 0x114   : > { %v964_v53 = vadd.f32 %v1086_v34, %v949_v40  ;;  %v950_v54 = vmul.f32 %v1151_v49, %v1085_v28 }
 0x115   : > { %v962_v55 = vadd.f32 %v1086_v34, %v947_v51  ;;  %v948_v44 = vmul.f32 %v1152_v52, %v1085_v28 }
 0x116   : > { %v972_v56 = vmax.f32 %v964_v53, 0.0  ;;  %v965_v57 = vadd.f32 %v1086_v34, %v950_v54 }
 0x117   : > { %v970_v23 = vmax.f32 %v962_v55, 0.0  ;;  %v963_v59 = vadd.f32 %v1086_v34, %v948_v44  ;;  %v1127_v60 = vpop.f32.mrb[4].mxu1 }
 0x118   : > { %981 = vst.msk [vmem:[%s1460_s12 + $0x10] sm:$0xff] %vm978_vm0, %v972_v56  ;;  %v973_v24 = vmax.f32 %v965_v57, 0.0  ;;  %v1153_v62 = vadd.f32 %v1147_v42, %v1127_v60  ;;  %v690_v63 = vpop.f32.mrb[5].mxu1 }
 0x119   : > { %979 = vst.msk [vmem:[%s1460_s12] sm:$0xff] %vm978_vm0, %v970_v23  ;;  %v971_v27 = vmax.f32 %v963_v59, 0.0  ;;  %v1154_v0 = vadd.f32 %v917_v43, %v690_v63  ;;  %v1128_v1 = vpop.f32.mrb[6].mxu1 }
 0x11a   : > { %982 = vst.msk [vmem:[%s1460_s12 + $0x18] sm:$0xff] %vm978_vm0, %v973_v24  ;;  %v953_v2 = vmul.f32 %v1153_v62, %v1085_v28  ;;  %v1155_v3 = vadd.f32 %v1148_v25, %v1128_v1  ;;  %v693_v30 = vpop.f32.mrb[7].mxu1 }
 0x11b   : > { %980 = vst.msk [vmem:[%s1460_s12 + $0x8] sm:$0xff] %vm978_vm0, %v971_v27  ;;  %v951_v4 = vmul.f32 %v1154_v0, %v1085_v28  ;;  %v1156_v5 = vadd.f32 %v920_v45, %v693_v30 }
 0x11c   : > { %v968_v6 = vadd.f32 %v1086_v34, %v953_v2  ;;  %v954_v7 = vmul.f32 %v1155_v3, %v1085_v28 }
 0x11d   : > { %v966_v8 = vadd.f32 %v1086_v34, %v951_v4  ;;  %v952_v9 = vmul.f32 %v1156_v5, %v1085_v28 }
 0x11e   : > { %v976_v10 = vmax.f32 %v968_v6, 0.0  ;;  %v969_v11 = vadd.f32 %v1086_v34, %v954_v7 }
 0x11f   : > { %v974_v12 = vmax.f32 %v966_v8, 0.0  ;;  %v967_v13 = vadd.f32 %v1086_v34, %v952_v9 }
 0x120   : > { %985 = vst.msk [vmem:[%s1460_s12 + $0x30] sm:$0xff] %vm978_vm0, %v976_v10  ;;  %v977_v14 = vmax.f32 %v969_v11, 0.0 }
 0x121   : > { %983 = vst.msk [vmem:[%s1460_s12 + $0x20] sm:$0xff] %vm978_vm0, %v974_v12  ;;  %v975_v16 = vmax.f32 %v967_v13, 0.0 }
 0x122   : > { %986 = vst.msk [vmem:[%s1460_s12 + $0x38] sm:$0xff] %vm978_vm0, %v977_v14 }
 0x123   : > { %984 = vst.msk [vmem:[%s1460_s12 + $0x28] sm:$0xff] %vm978_vm0, %v975_v16 }
 0x124 PF: > { %s14_s15 = sadd.s32 1, %s1199_s15  }
 0x125   : > { %p11_p5 = scmp.ge.s32.totalorder %s14_s15, 10  }
 0x127   :  { %13 = sbr.rel (!%p11_p5) target bundleno = 1 (0x1), region = 69 }

</bundles_post_ra>
